<compile_context>
chip_gen: v6e
topology: v6e:2x2x1
jax: 0.10.0
libtpu: 0.0.40
codegen_flags: <defaults>
</compile_context>

<pallas_src>
import functools

import jax
import jax.numpy as jnp
import numpy as np
from jax import lax
from jax.experimental import pallas as pl
from jax.experimental.pallas import tpu as pltpu


def _vq_kernel(x_ref, e_ref, esqh_ref,
               zq_ref, idx_ref, ohsum_ref, esum_ref,
               *, idx_bits, dist_dtype):
    """One (tile_n, D) tile: nearest-code search + codebook lookup + EMA statistics."""
    j = pl.program_id(1)                               # reduction ("arbitrary") axis

    x_in = x_ref[...]                                  # (TN, D)  input dtype (no blanket upcast)
    e = e_ref[...]                                     # (Kp, D)  f32, padded rows are zeros
    esq_half = esqh_ref[...]                           # (1, Kp)  0.5*||E_k||^2, padded cols huge
    tn = x_in.shape[0]
    kp = e.shape[0]

    # argmin_k ||x - e_k||^2 == argmin_k (0.5*||e_k||^2 - x.e_k)   (x^2 term dropped).
    # The x.E matmul only feeds the argmin, so it runs in bf16 on the MXU (native on all
    # generations, ~3x cheaper than f32 passes); accumulation stays f32.
    xe = lax.dot_general(x_in.astype(dist_dtype), e.astype(dist_dtype),
                         (((1,), (1,)), ((), ())),
                         preferred_element_type=jnp.float32)          # (TN, Kp)  MXU
    score = esq_half - xe                                             # (TN, Kp)  f32

    # Fused single-reduction argmin: map the f32 score bits to an order-preserving int32 key,
    # replace its low idx_bits with the lane index, and take ONE jnp.min per row (XLU).
    # Tie-break caveat: codes whose scores agree in all but the low idx_bits bits resolve to the
    # smaller index; the self-test below is tie-tolerant by distance.
    bits = pltpu.bitcast(score, jnp.int32)
    key = jnp.where(bits < 0, bits ^ jnp.int32(0x7FFFFFFF), bits)     # monotone f32 -> i32 map
    lane = lax.broadcasted_iota(jnp.int32, (tn, kp), 1)
    lo_mask = jnp.int32((1 << idx_bits) - 1)
    key = (key & jnp.int32(~((1 << idx_bits) - 1))) | lane            # index in the low bits
    min_key = jnp.min(key, axis=1, keepdims=True)                     # (TN, 1)  single reduction
    ind = min_key & lo_mask                                           # (TN, 1)  int32 argmin

    # Keys are unique per row (index bits differ), so equality with the row min IS the one-hot.
    onehot = (key == min_key).astype(jnp.float32)                     # (TN, Kp)

    # Codebook lookup as one-hot @ E (exact rows of E; padded rows are never selected).
    zq = jnp.dot(onehot, e, preferred_element_type=jnp.float32)       # (TN, D)  MXU
    # TODO(synk): at D<128 this store is lane-masked; a lane-dense repack (or dropping z_q and
    # reconstructing embed_weight[ind] in XLA) would trade XLU shuffles for vst slots (v5e win).
    zq_ref[...] = zq.astype(zq_ref.dtype)
    idx_ref[...] = ind.reshape(idx_ref.shape)                         # lane-dense (1, TN//128, 128)

    # EMA statistics: accumulators map to the same output block for every j -> VMEM resident.
    @pl.when(j == 0)
    def _():
        ohsum_ref[...] = jnp.zeros_like(ohsum_ref)
        esum_ref[...] = jnp.zeros_like(esum_ref)

    ohsum_ref[...] += jnp.sum(onehot, axis=0)[None, None, :]          # (1, 1, Kp)
    esum_ref[...] += lax.dot_general(                                 # (1, D, Kp)  x^T @ onehot
        x_in.astype(jnp.float32), onehot, (((0,), (0,)), ((), ())),
        preferred_element_type=jnp.float32)[None]


def _detect_tensorcores_per_chip():
    """2 on v7x-class chips (two TensorCores/chip), 1 on v5e/v6e; unknown -> 1 (safe)."""
    try:
        kind = jax.devices()[0].device_kind.lower()
    except Exception:
        return 1
    return 2 if ("v7" in kind or "7x" in kind) else 1


def _pick_tile_n(n, requested, k_pad):
    """Largest divisor of n that is a multiple of 128, <= requested, and VMEM-safe."""
    # Bound the in-kernel (TN, Kp) score/key/one-hot working set (v7x has only 64 MiB VMEM/TC).
    # TODO(synk): for very large codebooks (K >= ~4096) chunk the codebook inside the kernel
    # with a running (min-key, per-chunk esum) instead of only capping the tile here.
    budget = 24 * 1024 * 1024
    cap = max(128, (budget // (12 * k_pad)) // 128 * 128)
    requested = max(128, min(int(requested), cap))
    best = 0
    t = 128
    while t <= min(n, requested):
        if n % t == 0:
            best = t
        t += 128
    if best == 0:
        # TODO(synk): pad N up to a multiple of 128 (with masked stats) instead of failing.
        raise ValueError("prod(z_e.shape[:-1]) must be a multiple of 128")
    return best


@functools.partial(jax.jit, static_argnames=("decay", "eps", "training",
                                              "tile_n", "n_par", "dist_dtype"))
def ema_quantizer_forward(z_e, embed_weight, cluster_size, embed_avg, *,
                          decay=0.99, eps=1e-5, training=True,
                          tile_n=2048, n_par=None, dist_dtype=jnp.bfloat16):
    """Returns ((z_q, diff, embed_ind), (new_embed_weight, new_cluster_size, new_embed_avg))."""
    orig_shape = z_e.shape
    k, d = embed_weight.shape
    flat = z_e.reshape(-1, d)
    n = flat.shape[0]

    # Pad the codebook K up to a multiple of 128 (lane-full score/one-hot, better MXU N-dim).
    k_pad = ((k + 127) // 128) * 128
    pad_k = k_pad - k
    e_f32 = embed_weight.astype(jnp.float32)
    e_pad = jnp.pad(e_f32, ((0, pad_k), (0, 0)))                       # dummy rows are zeros
    esq_half = 0.5 * jnp.sum(e_f32 * e_f32, axis=1)                    # hoisted ||E||^2 / 2
    esq_half = jnp.pad(esq_half, (0, pad_k), constant_values=1e30)[None, :]   # (1, Kp)

    tile_n = _pick_tile_n(n, tile_n, k_pad)
    n_tiles = n // tile_n

    # Leading "parallel" grid axis so v7x's two TensorCores each own half of the tiles.
    # On single-TC chips (v5e/v6e) n_par stays 1 (a size-2 axis would only duplicate accumulators).
    if n_par is None:
        n_par = _detect_tensorcores_per_chip()
    n_par = int(n_par)
    if n_par < 1 or n_tiles % n_par != 0:
        n_par = 1
    tpc = n_tiles // n_par                               # tiles handled per parallel slice

    idx_rows = tile_n // 128
    idx_bits = max(1, (k_pad - 1).bit_length())

    kernel = functools.partial(_vq_kernel, idx_bits=idx_bits, dist_dtype=dist_dtype)

    zq_flat, idx_out, ohsum_out, esum_out = pl.pallas_call(
        kernel,
        out_shape=(
            jax.ShapeDtypeStruct((n, d), z_e.dtype),                     # z_q (flattened)
            jax.ShapeDtypeStruct((n_tiles, idx_rows, 128), jnp.int32),   # embed_ind, lane-dense
            jax.ShapeDtypeStruct((n_par, 1, k_pad), jnp.float32),        # onehot sums per slice
            jax.ShapeDtypeStruct((n_par, d, k_pad), jnp.float32),        # x^T @ onehot per slice
        ),
        grid_spec=pltpu.PrefetchScalarGridSpec(
            num_scalar_prefetch=0,
            grid=(n_par, tpc),
            in_specs=[
                pl.BlockSpec((tile_n, d), lambda p, j: (p * tpc + j, 0)),   # flatten tile
                # TODO(synk): pipeline_mode=pl.Buffered(1) on the two loop-invariant codebook
                # inputs would free the dead second buffer for production-size codebooks.
                pl.BlockSpec((k_pad, d), lambda p, j: (0, 0)),              # full padded codebook
                pl.BlockSpec((1, k_pad), lambda p, j: (0, 0)),              # hoisted 0.5*||E||^2
            ],
            out_specs=[
                pl.BlockSpec((tile_n, d), lambda p, j: (p * tpc + j, 0)),
                pl.BlockSpec((1, idx_rows, 128), lambda p, j: (p * tpc + j, 0, 0)),
                pl.BlockSpec((1, 1, k_pad), lambda p, j: (p, 0, 0)),
                pl.BlockSpec((1, d, k_pad), lambda p, j: (p, 0, 0)),
            ],
        ),
        compiler_params=pltpu.CompilerParams(
            dimension_semantics=("parallel", "arbitrary"),
            vmem_limit_bytes=48 * 1024 * 1024,                            # fits v7x 64 MiB/TC
        ),
    )(flat, e_pad, esq_half)

    # ---- plain-JAX glue (mirrors the PyTorch forward) ----
    embed_ind = idx_out.reshape(orig_shape[:-1])
    zq = zq_flat.reshape(orig_shape)
    zq_sg = lax.stop_gradient(zq)

    # diff is recomputed in plain JAX (not taken from the kernel) so the commitment-loss
    # gradient w.r.t. z_e flows correctly without a custom VJP for the pallas_call.
    # TODO(synk): the second term's gradient into the codebook (present in PyTorch) is dropped;
    # the codebook is trained by the EMA update, not by gradients.
    commitment_cost = 0.25
    diff = (commitment_cost * jnp.mean((zq_sg - z_e) ** 2)
            + jnp.mean((zq_sg - lax.stop_gradient(z_e)) ** 2))

    # Straight-through estimator.
    z_q = z_e + lax.stop_gradient(zq - z_e)

    if training:
        ohsum = jnp.sum(ohsum_out, axis=(0, 1))[:k]          # (K,)   strip padded codes
        esum = jnp.sum(esum_out, axis=0)[:, :k]              # (D, K)
        # TODO(synk): under data parallelism, all-reduce ohsum/esum across replicas first.
        new_cluster_size = decay * cluster_size + (1.0 - decay) * ohsum
        new_embed_avg = decay * embed_avg + (1.0 - decay) * esum
        tot = new_cluster_size.sum()
        cs = (new_cluster_size + eps) / (tot + k * eps) * tot
        new_embed_weight = (new_embed_avg / cs[None, :]).T   # (K, D)
    else:
        new_cluster_size = cluster_size
        new_embed_avg = embed_avg
        new_embed_weight = embed_weight

    # TODO(synk): PyTorch mutates the buffers in-place; here the updated buffers are returned.
    return (z_q, diff, embed_ind), (new_embed_weight, new_cluster_size, new_embed_avg)


def _reference_distances(z_e, embed_weight):
    """f64 reference of the full expanded distances, plus the flattened f64 inputs."""
    d = embed_weight.shape[1]
    flat = np.asarray(z_e, np.float64).reshape(-1, d)
    e = np.asarray(embed_weight, np.float64)
    dist = ((flat ** 2).sum(1, keepdims=True) - 2.0 * flat @ e.T
            + (e ** 2).sum(1, keepdims=True).T)
    return dist, flat, e


def _reference_ema(flat64, e64, cluster_size, embed_avg, ind, decay, eps):
    """f64 reference of the training-branch EMA buffer updates, driven by given indices."""
    k, _ = e64.shape
    onehot = np.zeros((flat64.shape[0], k), np.float64)
    onehot[np.arange(flat64.shape[0]), ind] = 1.0
    ohsum = onehot.sum(0)
    esum = flat64.T @ onehot
    cs = decay * np.asarray(cluster_size, np.float64) + (1.0 - decay) * ohsum
    avg = decay * np.asarray(embed_avg, np.float64) + (1.0 - decay) * esum
    tot = cs.sum()
    csn = (cs + eps) / (tot + k * eps) * tot
    w = (avg / csn[None, :]).T
    return w, cs, avg


if __name__ == "__main__":
    embedding_dim = 32
    n_embed = 64
    B, H, W = 2, 16, 16

    key = jax.random.PRNGKey(0)
    k_z, k_e = jax.random.split(key)

    # z_e in channel-last layout (B, H, W, D); see layout note above.
    z_e = jax.random.normal(k_z, (B, H, W, embedding_dim), dtype=jnp.float32)
    embed_weight = jax.random.normal(k_e, (n_embed, embedding_dim), dtype=jnp.float32)
    cluster_size = jnp.zeros((n_embed,), dtype=jnp.float32)
    embed_avg = embed_weight.T                               # (D, K), as in PyTorch __init__

    dist_ref, flat64, e64 = _reference_distances(z_e, embed_weight)
    min_ref = dist_ref.min(axis=1)
    n_vec = flat64.shape[0]

    # Cases exercise: multi-tile + 2-way parallel split, f32 distance path, and the
    # tile_n clamp (4096 -> 512). The argmin check is tie-tolerant by distance because the
    # bf16 distance matmul / packed-key tie-break may pick a different but near-optimal code.
    cases = [
        dict(tile_n=128, n_par=2, dist_dtype=jnp.bfloat16, tol=1.0),
        dict(tile_n=256, n_par=1, dist_dtype=jnp.float32, tol=1e-2),
        dict(tile_n=4096, n_par=None, dist_dtype=jnp.bfloat16, tol=1.0),
    ]
    for case in cases:
        (z_q, diff, embed_ind), (new_w, new_cs, new_avg) = ema_quantizer_forward(
            z_e, embed_weight, cluster_size, embed_avg,
            decay=0.99, eps=1e-5, training=True,
            tile_n=case["tile_n"], n_par=case["n_par"], dist_dtype=case["dist_dtype"])
        jax.block_until_ready((z_q, diff, embed_ind, new_w, new_cs, new_avg))

        ind = np.asarray(embed_ind).reshape(-1)
        assert embed_ind.shape == (B, H, W)
        assert ind.min() >= 0 and ind.max() < n_embed

        # Every chosen code must be (near-)optimal under the exact f64 distance.
        chosen = dist_ref[np.arange(n_vec), ind]
        assert np.all(chosen <= min_ref + case["tol"]), "chosen codes are not near-optimal"

        # Straight-through output must equal the looked-up codebook rows for the chosen codes.
        np.testing.assert_allclose(np.asarray(z_q).reshape(-1, embedding_dim),
                                   e64[ind], rtol=1e-6, atol=1e-5)

        # diff == 1.25 * mean((z_q - z_e)^2) for the codes the kernel selected.
        diff_expect = 1.25 * np.mean((e64[ind] - flat64) ** 2)
        np.testing.assert_allclose(float(diff), diff_expect, rtol=1e-3, atol=1e-4)

        # EMA buffers, validated against an f64 reference driven by the kernel's own indices.
        w_ref, cs_ref, avg_ref = _reference_ema(
            flat64, e64, np.zeros(n_embed), e64.T, ind, 0.99, 1e-5)
        np.testing.assert_allclose(np.asarray(new_cs), cs_ref, rtol=1e-4, atol=1e-5)
        np.testing.assert_allclose(np.asarray(new_avg), avg_ref, rtol=1e-4, atol=1e-4)
        np.testing.assert_allclose(np.asarray(new_w), w_ref, rtol=5e-4, atol=1e-4)

    print("KERNEL_OK")
</pallas_src>

<mosaic_0001>
module attributes {stable_mosaic.version = 11 : i64} {
  func.func @_vq_kernel(%arg0: i32, %arg1: i32, %arg2: memref<128x32xf32, #tpu.memory_space<vmem>>, %arg3: memref<128x32xf32, #tpu.memory_space<vmem>>, %arg4: memref<1x128xf32, #tpu.memory_space<vmem>>, %arg5: memref<128x32xf32, #tpu.memory_space<vmem>>, %arg6: memref<1x1x128xi32, #tpu.memory_space<vmem>>, %arg7: memref<1x1x128xf32, #tpu.memory_space<vmem>>, %arg8: memref<1x32x128xf32, #tpu.memory_space<vmem>>) attributes {dimension_semantics = [#tpu.dimension_semantics<parallel>, #tpu.dimension_semantics<arbitrary>], iteration_bounds = array<i64: 2, 2>, scalar_prefetch = 0 : i64, scratch_operands = 0 : i64, tpu.core_type = #tpu.core_type<tc>, window_params = [{transform_indices = @transform_0, window_bounds = array<i64: 128, 32>}, {pipeline_mode = #tpu.pipeline_mode<synchronous>, transform_indices = @transform_1, window_bounds = array<i64: 128, 32>}, {pipeline_mode = #tpu.pipeline_mode<synchronous>, transform_indices = @transform_2, window_bounds = array<i64: 1, 128>}, {transform_indices = @transform_3, window_bounds = array<i64: 128, 32>}, {transform_indices = @transform_4, window_bounds = array<i64: 1, 1, 128>}, {transform_indices = @transform_5, window_bounds = array<i64: 1, 1, 128>}, {transform_indices = @transform_6, window_bounds = array<i64: 1, 32, 128>}]} {
    %c0 = arith.constant 0 : index
    %c0_0 = arith.constant 0 : index
    %0 = vector.load %arg2[%c0, %c0_0] : memref<128x32xf32, #tpu.memory_space<vmem>>, vector<128x32xf32>
    %c0_1 = arith.constant 0 : index
    %c0_2 = arith.constant 0 : index
    %1 = vector.load %arg3[%c0_1, %c0_2] : memref<128x32xf32, #tpu.memory_space<vmem>>, vector<128x32xf32>
    %c0_3 = arith.constant 0 : index
    %c0_4 = arith.constant 0 : index
    %2 = vector.load %arg4[%c0_3, %c0_4] : memref<1x128xf32, #tpu.memory_space<vmem>>, vector<1x128xf32>
    %3 = arith.truncf %0 : vector<128x32xf32> to vector<128x32xbf16>
    %4 = arith.truncf %1 : vector<128x32xf32> to vector<128x32xbf16>
    %cst = arith.constant dense<0.000000e+00> : vector<128x128xf32>
    %5 = tpu.matmul %3, %4, %cst {dimension_numbers = #tpu.dot_dimension_numbers<[1], [1], [0], [0], [0, 0, 1, 0], [], []>} : vector<128x32xbf16>, vector<128x32xbf16>, vector<128x128xf32> -> vector<128x128xf32>
    %6 = vector.broadcast %2 : vector<1x128xf32> to vector<128x128xf32>
    %7 = arith.subf %6, %5 : vector<128x128xf32>
    %8 = tpu.bitcast %7 : vector<128x128xf32> -> vector<128x128xi32>
    %c0_i32 = arith.constant 0 : i32
    %9 = vector.broadcast %c0_i32 : i32 to vector<128x128xi32>
    %10 = arith.cmpi slt, %8, %9 : vector<128x128xi32>
    %c2147483647_i32 = arith.constant 2147483647 : i32
    %11 = vector.broadcast %c2147483647_i32 : i32 to vector<128x128xi32>
    %12 = arith.xori %8, %11 : vector<128x128xi32>
    %13 = arith.select %10, %12, %8 : vector<128x128xi1>, vector<128x128xi32>
    %14 = tpu.iota {dimensions = array<i32: 1>} : vector<128x128xi32>
    %c-128_i32 = arith.constant -128 : i32
    %15 = vector.broadcast %c-128_i32 : i32 to vector<128x128xi32>
    %16 = arith.andi %13, %15 : vector<128x128xi32>
    %17 = arith.ori %16, %14 : vector<128x128xi32>
    %cst_5 = arith.constant dense<2147483647> : vector<128xi32>
    %18 = vector.multi_reduction <minsi>, %17, %cst_5 [1] : vector<128x128xi32> to vector<128xi32>
    %19 = vector.shape_cast %18 : vector<128xi32> to vector<128x1xi32>
    %c127_i32 = arith.constant 127 : i32
    %20 = vector.broadcast %c127_i32 : i32 to vector<128x1xi32>
    %21 = arith.andi %19, %20 : vector<128x1xi32>
    %22 = vector.broadcast %19 : vector<128x1xi32> to vector<128x128xi32>
    %23 = arith.cmpi eq, %17, %22 : vector<128x128xi32>
    %24 = arith.extui %23 : vector<128x128xi1> to vector<128x128xi32>
    %25 = arith.sitofp %24 : vector<128x128xi32> to vector<128x128xf32>
    %cst_6 = arith.constant dense<0.000000e+00> : vector<128x32xf32>
    %26 = tpu.matmul %25, %1, %cst_6 {dimension_numbers = #tpu.dot_dimension_numbers<[1], [0], [0], [1], [0, 0, 1, 1], [], []>} : vector<128x128xf32>, vector<128x32xf32>, vector<128x32xf32> -> vector<128x32xf32>
    %c0_7 = arith.constant 0 : index
    %c0_8 = arith.constant 0 : index
    %27 = vector.load %arg5[%c0_7, %c0_8] : memref<128x32xf32, #tpu.memory_space<vmem>>, vector<128x32xf32>
    tpu.vector_store %arg5[%c0_7, %c0_8], %26 {strides = array<i32>} : memref<128x32xf32, #tpu.memory_space<vmem>>, vector<128x32xf32>,
    %28 = vector.shape_cast %21 : vector<128x1xi32> to vector<1x1x128xi32>
    %c0_9 = arith.constant 0 : index
    %c0_10 = arith.constant 0 : index
    %c0_11 = arith.constant 0 : index
    %29 = vector.load %arg6[%c0_9, %c0_10, %c0_11] : memref<1x1x128xi32, #tpu.memory_space<vmem>>, vector<1x1x128xi32>
    tpu.vector_store %arg6[%c0_9, %c0_10, %c0_11], %28 {strides = array<i32>} : memref<1x1x128xi32, #tpu.memory_space<vmem>>, vector<1x1x128xi32>,
    %c0_i32_12 = arith.constant 0 : i32
    %30 = arith.cmpi eq, %arg1, %c0_i32_12 : i32
    %31 = arith.extui %30 : i1 to i32
    %c0_i32_13 = arith.constant 0 : i32
    %32 = arith.cmpi ne, %31, %c0_i32_13 : i32
    scf.if %32 {
      %cst_28 = arith.constant 0.000000e+00 : f32
      %43 = vector.broadcast %cst_28 : f32 to vector<1x1x128xf32>
      %c0_29 = arith.constant 0 : index
      %c0_30 = arith.constant 0 : index
      %c0_31 = arith.constant 0 : index
      %44 = vector.load %arg7[%c0_29, %c0_30, %c0_31] : memref<1x1x128xf32, #tpu.memory_space<vmem>>, vector<1x1x128xf32>
      tpu.vector_store %arg7[%c0_29, %c0_30, %c0_31], %43 {strides = array<i32>} : memref<1x1x128xf32, #tpu.memory_space<vmem>>, vector<1x1x128xf32>,
      %cst_32 = arith.constant 0.000000e+00 : f32
      %45 = vector.broadcast %cst_32 : f32 to vector<1x32x128xf32>
      %c0_33 = arith.constant 0 : index
      %c0_34 = arith.constant 0 : index
      %c0_35 = arith.constant 0 : index
      %46 = vector.load %arg8[%c0_33, %c0_34, %c0_35] : memref<1x32x128xf32, #tpu.memory_space<vmem>>, vector<1x32x128xf32>
      tpu.vector_store %arg8[%c0_33, %c0_34, %c0_35], %45 {strides = array<i32>} : memref<1x32x128xf32, #tpu.memory_space<vmem>>, vector<1x32x128xf32>,
    } else {
    }
    %c0_14 = arith.constant 0 : index
    %c0_15 = arith.constant 0 : index
    %c0_16 = arith.constant 0 : index
    %33 = vector.load %arg7[%c0_14, %c0_15, %c0_16] : memref<1x1x128xf32, #tpu.memory_space<vmem>>, vector<1x1x128xf32>
    %cst_17 = arith.constant dense<0.000000e+00> : vector<128xf32>
    %34 = vector.multi_reduction <add>, %25, %cst_17 [0] : vector<128x128xf32> to vector<128xf32>
    %35 = vector.shape_cast %34 : vector<128xf32> to vector<1x1x128xf32>
    %36 = arith.addf %33, %35 : vector<1x1x128xf32>
    %c0_18 = arith.constant 0 : index
    %c0_19 = arith.constant 0 : index
    %c0_20 = arith.constant 0 : index
    %37 = vector.load %arg7[%c0_18, %c0_19, %c0_20] : memref<1x1x128xf32, #tpu.memory_space<vmem>>, vector<1x1x128xf32>
    tpu.vector_store %arg7[%c0_18, %c0_19, %c0_20], %36 {strides = array<i32>} : memref<1x1x128xf32, #tpu.memory_space<vmem>>, vector<1x1x128xf32>,
    %c0_21 = arith.constant 0 : index
    %c0_22 = arith.constant 0 : index
    %c0_23 = arith.constant 0 : index
    %38 = vector.load %arg8[%c0_21, %c0_22, %c0_23] : memref<1x32x128xf32, #tpu.memory_space<vmem>>, vector<1x32x128xf32>
    %cst_24 = arith.constant dense<0.000000e+00> : vector<32x128xf32>
    %39 = tpu.matmul %0, %25, %cst_24 {dimension_numbers = #tpu.dot_dimension_numbers<[0], [0], [1], [1], [0, 1, 1, 1], [], []>} : vector<128x32xf32>, vector<128x128xf32>, vector<32x128xf32> -> vector<32x128xf32>
    %40 = vector.shape_cast %39 : vector<32x128xf32> to vector<1x32x128xf32>
    %41 = arith.addf %38, %40 : vector<1x32x128xf32>
    %c0_25 = arith.constant 0 : index
    %c0_26 = arith.constant 0 : index
    %c0_27 = arith.constant 0 : index
    %42 = vector.load %arg8[%c0_25, %c0_26, %c0_27] : memref<1x32x128xf32, #tpu.memory_space<vmem>>, vector<1x32x128xf32>
    tpu.vector_store %arg8[%c0_25, %c0_26, %c0_27], %41 {strides = array<i32>} : memref<1x32x128xf32, #tpu.memory_space<vmem>>, vector<1x32x128xf32>,
    return
  }
  func.func @transform_0(%arg0: i32, %arg1: i32) -> (i32, i32) {
    %c2_i32 = arith.constant 2 : i32
    %0 = arith.muli %arg0, %c2_i32 : i32
    %1 = arith.addi %0, %arg1 : i32
    %c0_i32 = arith.constant 0 : i32
    %c0_i32_0 = arith.constant 0 : i32
    return %1, %c0_i32 : i32, i32
  }
  func.func @transform_1(%arg0: i32, %arg1: i32) -> (i32, i32) {
    %c0_i32 = arith.constant 0 : i32
    %c0_i32_0 = arith.constant 0 : i32
    %c0_i32_1 = arith.constant 0 : i32
    return %c0_i32, %c0_i32_0 : i32, i32
  }
  func.func @transform_2(%arg0: i32, %arg1: i32) -> (i32, i32) {
    %c0_i32 = arith.constant 0 : i32
    %c0_i32_0 = arith.constant 0 : i32
    %c0_i32_1 = arith.constant 0 : i32
    return %c0_i32, %c0_i32_0 : i32, i32
  }
  func.func @transform_3(%arg0: i32, %arg1: i32) -> (i32, i32) {
    %c2_i32 = arith.constant 2 : i32
    %0 = arith.muli %arg0, %c2_i32 : i32
    %1 = arith.addi %0, %arg1 : i32
    %c0_i32 = arith.constant 0 : i32
    %c0_i32_0 = arith.constant 0 : i32
    return %1, %c0_i32 : i32, i32
  }
  func.func @transform_4(%arg0: i32, %arg1: i32) -> (i32, i32, i32) {
    %c2_i32 = arith.constant 2 : i32
    %0 = arith.muli %arg0, %c2_i32 : i32
    %1 = arith.addi %0, %arg1 : i32
    %c0_i32 = arith.constant 0 : i32
    %c0_i32_0 = arith.constant 0 : i32
    %c0_i32_1 = arith.constant 0 : i32
    return %1, %c0_i32, %c0_i32_0 : i32, i32, i32
  }
  func.func @transform_5(%arg0: i32, %arg1: i32) -> (i32, i32, i32) {
    %c0_i32 = arith.constant 0 : i32
    %c0_i32_0 = arith.constant 0 : i32
    %c0_i32_1 = arith.constant 0 : i32
    return %arg0, %c0_i32, %c0_i32_0 : i32, i32, i32
  }
  func.func @transform_6(%arg0: i32, %arg1: i32) -> (i32, i32, i32) {
    %c0_i32 = arith.constant 0 : i32
    %c0_i32_0 = arith.constant 0 : i32
    %c0_i32_1 = arith.constant 0 : i32
    return %arg0, %c0_i32, %c0_i32_0 : i32, i32, i32
  }
}

</mosaic_0001>

<bundles_post_ra>
// kernel: ema_quantizer_forward.1
= control target key start
LH: loop header
LB: loop body
LE: loop exit
PB: predicated region body
PF: predicated region fallthrough
CT: control target
= control target key end

     0   :  { %12 = vsyncpa [#allocation3], 0  ;;  %s3143_s0 = inlined_call_operand.hbm [shape: f32[512,32], index: 0, kind: input, shape index: {}]   ;;  %s3144_s1 = inlined_call_operand.vmem [shape: f32[128,32], index: 1, kind: input, shape index: {}]   ;;  %s3145_s2 = inlined_call_operand.vmem [shape: f32[1,128], index: 2, kind: input, shape index: {}]   ;;  %s3146_s3 = inlined_call_operand.vmem [shape: f32[512,32], index: 3, kind: output, shape index: {0}]   ;;  %s3147_s4 = inlined_call_operand.vmem [shape: s32[4,1,128], index: 4, kind: output, shape index: {1}]   ;;  %s3148_s5 = inlined_call_operand.vmem [shape: f32[2,1,128], index: 5, kind: output, shape index: {2}]   ;;  %s3149_s6 = inlined_call_operand.vmem [shape: f32[2,32,128], index: 6, kind: output, shape index: {3}]  }
   0x1   :  { %14 = vsyncpa [#allocation3 + $0x1], 0  ;;  %s2055_s21 = smov 0   ;;  %s2057_s22 = smov 0  }
   0x2   :  { %s2059_s23 = smov 0   ;;  %s2061_s24 = smov 0  }
   0x3   :  { %s2063_s25 = smov 0   ;;  %s2065_s26 = smov 0  }
   0x4   :  { %s2067_s27 = smov 0   ;;  %s2069_s28 = smov 0  }
   0x5 LB: > { %3188 = sst [smem:[#allocation5_spill]] %s2004_s26  ;;  %s1556_s29 = sadd.s32 4294967295, %s2012_s28   ;;  %s2012_s28 = sphi %s2069_s28, %s20_s28   ;;  %s2008_s27 = sphi %s2067_s27, %s3252_s27   ;;  %s2004_s26 = sphi %s2065_s26, %s3251_s26   ;;  %s2000_s25 = sphi %s2063_s25, %s3247_s25   ;;  %s1996_s24 = sphi %s2061_s24, %s3246_s24   ;;  %s1992_s23 = sphi %s2059_s23, %s3250_s23   ;;  %s1988_s22 = sphi %s2057_s22, %s3249_s22   ;;  %s1984_s21 = sphi %s2055_s21, %s3248_s21  }
   0x6   : > { %3189 = sst [smem:[#allocation6_spill]] %s2008_s27  ;;  %s29_s30 = sadd.s32 1, %s2004_s26 }
   0x7   : > { %p30_p0 = scmp.ge.s32.totalorder %s29_s30, 2  ;;  %s32_s7 = sadd.s32 1, %s2008_s27 }
   0x8   : > { %s1558_s8 = sshll.u32 %s2008_s27, 1  ;;  %s43_s9 = sadd.s32 1, %s1992_s23 }
   0x9   : > { %s3254_s30 = smov (%p30_p0, %s29_s30), 0  ;;  %s3256_s7 = smov (!%p30_p0, %s32_s7), %s2008_s27 }
   0xa   : > { %s37_s10 = sadd.s32 %s2004_s26, %s1558_s8  ;;  %p50_p1 = scmp.ne.s32.totalorder %s1992_s23, %s1988_s22 }
   0xb   : > { %p34_p2 = scmp.ge.s32.totalorder %s3256_s7, 2  ;;  %p51_p3 = scmp.eq.s32.totalorder %s2012_s28, 0 }
   0xc   : > { %p56_p4 = scmp.ne.s32.totalorder %s1988_s22, %s1984_s21  ;;  %p57_p5 = scmp.eq.s32.totalorder %s1556_s29, 0 }
   0xd   : > { %s3258_s7 = smov (%p34_p2, %s3256_s7), 0  ;;  %p2108_p6 = por %p51_p3, %p50_p1 }
   0xe   : > { %p2112_p7 = por %p57_p5, %p56_p4  ;;  %s1559_s13 = sshll.u32 %s3258_s7, 1 }
   0xf   : > { %s39_s14 = sadd.s32 %s1559_s13, %s3254_s30  ;;  %p1848_p8 = scmp.lt.s32.totalorder %s2012_s28, 4 }
  0x10   : > { %s40_s15 = ssub.s32 %s37_s10, %s39_s14  ;;  %s240_s16 = sand.u32 1, %s1992_s23  }
  0x11   : > { %p41_p9 = scmp.eq.s32.totalorder %s40_s15, 0  ;;  %s1566_s17 = sshll.u32 %s240_s16, 7 }
  0x12   : > { %s1638_s18 = sshll.u32 %s37_s10, 11  ;;  %s244_s8 = scalar_lea.vmem [#allocation2], %s1566_s17 }
  0x13   : > { %s2121_s19 = scalar_select %p41_p9, %s1992_s23, %s43_s9  }
  0x14   : > { %s252_s29 = scalar_lea.hbm %s3143_s0, %s1638_s18  ;;  %s253_s27 = sshll.u32 %s244_s8, 4  ;;  %s254_s27 = int_to_ptr.vmem [resolvable:$true] %s253_s27 }
  0x15   : > { %p2128_p10 = pnand %p1848_p8, %p2108_p6  ;;  %s241_s13 = scalar_lea.sflag [#allocation3], %s240_s16 }
  0x16   : > { %s1931_s14 = scalar_lea.vmem %s254_s27, 2048  ;;  %s2014_s9 = smov [#allocation2]  }
  0x17   : > { %p1920_p11 = pneg %p2128_p10  ;;  %p1932_p12 = scmp.ne.s32.totalorder %s254_s27, %s1931_s14 }
  0x18   : > { %s1936_s10 = sshll.u32 %s2014_s9, 4  ;;  %s1937_s10 = int_to_ptr.vmem [resolvable:$false] %s1936_s10 }
  0x19   : > { %p1934_p13 = pnand %p1932_p12, %p1920_p11  ;;  %s1938_s15 = scalar_lea.vmem %s1937_s10, 4096 }
  0x1a   : > { %p1939_p1 = scmp.lt.s32.totalorder %s254_s27, %s1937_s10  ;;  %p1940_p2 = scmp.lt.s32.totalorder %s1938_s15, %s1931_s14 }
  0x1b   : > { %p1935_p0 = pneg %p1934_p13 }
  0x1c   : > { %p1941_p3 = por %p1940_p2, %p1939_p1 }
  0x1e   : > { %p1942_p4 = pnand %p1941_p3, %p1935_p0 }
  0x20   : > { %1945 = shalt.err (!%p1942_p4)
}
  0x21   : > { %s2015_s11 = smov 128   ;;  %s2016_s16 = smov 8  }
  0x22   : > { %1847 = dma.hbm_to_vmem [thread:$0]  (!%p2128_p10), %s252_s29, 2048, %s254_s27, %s241_s13, %s2015_s11, %s2015_s11, %s2016_s16  }
  0x23   : > { %p1570_p5 = scmp.ge.s32.totalorder %s2012_s28, 1  ;;  %p261_p6 = scmp.lt.s32.totalorder %s2012_s28, 5 }
  0x25   : > { %p262_p8 = pnand %p1570_p5, %p261_p6 }
  0x27   : > { %265 = sbr.rel (%p262_p8) target bundleno = 1176 (0x498), region = 32 }
  0x2c   : > { %s267_s17 = sand.u32 1, %s1988_s22  }
  0x2d   : > { %s1571_s18 = sshll.u32 %s267_s17, 7  ;;  %s268_s20 = scalar_lea.sflag [#allocation3], %s267_s17 }
  0x2e   : > { %s2139_s21 = scalar_lea.vmem [#allocation2], %s1571_s18 }
  0x2f   : > { %1979 = dma.done.wait (%p2112_p7), %s268_s20, 2048  }
  0x30   : > { %1981 = vsyncadd (%p2112_p7), %s268_s20, 4294965248  ;;  %p335_p9 = scmp.lt.s32.totalorder %s2000_s25, 1  ;;  %v374_v0 = vld [vmem:[%s3144_s1 + $0x70] sm:$0xff]  ;;  %v375_v1 = vld [vmem:[%s3144_s1 + $0x78] sm:$0xff]  ;;  %vm393_vm0 = vcmask 261120   ;;  %v3152_v58 = vlaneseq  ;;  %p1619_p11 = scmp.ne.s32.totalorder %s1996_s24, 0 }
  0x31   : > { %v372_v2 = vld [vmem:[%s3144_s1 + $0x60] sm:$0xff]  ;;  %v392_v3 = vpack.c.bf16 %v375_v1, %v374_v0  ;;  %v373_v4 = vld [vmem:[%s3144_s1 + $0x68] sm:$0xff]  ;;  %1740 = vmatprep.subr.mxu1 %v375_v1  ;;  %v370_v9 = vld [vmem:[%s3144_s1 + $0x50] sm:$0xff] }
  0x32   : > { %s336_s26 = scalar_select %p335_p9, %s2000_s25, 1  ;;  %v391_v5 = vpack.c.bf16 %v373_v4, %v372_v2  ;;  %1741 = vmatpush3.msra.mxu1 %v375_v1  ;;  %v2173_v7 = vld [vmem:[%s2139_s21] sm:$0xff]  ;;  %v2176_v8 = vld [vmem:[%s2139_s21 + $0x8] sm:$0xff]  ;;  %v371_v10 = vld [vmem:[%s3144_s1 + $0x58] sm:$0xff] }
  0x33   : > { %1834 = vmatprep.subr.msk.bf16.mxu0 %vm393_vm0, %v392_v3  ;;  %v440_v6 = vsel %vm393_vm0, %v392_v3, 0  ;;  %1742 = vmatprep.subr.mxu1 %v374_v0  ;;  %v377_v11 = vpack.c.bf16 %v2176_v8, %v2173_v7  ;;  %v390_v13 = vpack.c.bf16 %v371_v10, %v370_v9  ;;  %v369_v14 = vld [vmem:[%s3144_s1 + $0x48] sm:$0xff]  ;;  %v368_v15 = vld [vmem:[%s3144_s1 + $0x40] sm:$0xff]  ;;  %v367_v16 = vld [vmem:[%s3144_s1 + $0x38] sm:$0xff] }
  0x34   : > { %s2150_s8 = scalar_lea.vmem %s3148_s5, %s336_s26  ;;  %s1639_s13 = sshll.u32 %s336_s26, 5  ;;  %1709 = vmatpush3.bf16.xpose.msra.mxu0 %v440_v6  ;;  %1743 = vmatpush3.msra.mxu1 %v374_v0  ;;  %v437_v12 = vsel %vm393_vm0, %v391_v5, 0  ;;  %v389_v18 = vpack.c.bf16 %v369_v14, %v368_v15  ;;  %v366_v19 = vld [vmem:[%s3144_s1 + $0x30] sm:$0xff]  ;;  %v365_v20 = vld [vmem:[%s3144_s1 + $0x28] sm:$0xff]  ;;  %v364_v21 = vld [vmem:[%s3144_s1 + $0x20] sm:$0xff]  ;;  %v2301_v0 = vand.u32 127, %v3152_v58 }
  0x35   : > { %s2155_s10 = scalar_lea.vmem %s3149_s6, %s1639_s13  ;;  %1835 = vmatprep.subr.msk.bf16.mxu0 %vm393_vm0, %v391_v5  ;;  %1744 = vmatprep.subr.mxu1 %v373_v4  ;;  %v434_v17 = vsel %vm393_vm0, %v390_v13, 0  ;;  %v363_v22 = vld [vmem:[%s3144_s1 + $0x18] sm:$0xff]  ;;  %v388_v24 = vpack.c.bf16 %v367_v16, %v366_v19  ;;  %v362_v25 = vld [vmem:[%s3144_s1 + $0x10] sm:$0xff]  ;;  %v361_v26 = vld [vmem:[%s3144_s1 + $0x8] sm:$0xff]  ;;  %v387_v29 = vpack.c.bf16 %v365_v20, %v364_v21 }
  0x36   : > { %1745 = vmatpush3.msra.mxu1 %v373_v4  ;;  %1724 = vmatprep.mubr.msk.bf16.mxu0 %vm393_vm0, %v377_v11  ;;  %v431_v23 = vsel %vm393_vm0, %v389_v18, 0  ;;  %v360_v27 = vld [vmem:[%s3144_s1] sm:$0xff]  ;;  %v386_v31 = vpack.c.bf16 %v363_v22, %v362_v25  ;;  %v2231_v35 = vld [vmem:[%s2139_s21 + $0x10] sm:$0xff]  ;;  %v2234_v36 = vld [vmem:[%s2139_s21 + $0x18] sm:$0xff] }
  0x37   : > { %1746 = vmatprep.subr.mxu1 %v372_v2  ;;  %v428_v28 = vsel %vm393_vm0, %v388_v24, 0  ;;  %v425_v30 = vsel %vm393_vm0, %v387_v29, 0  ;;  %v385_v33 = vpack.c.bf16 %v361_v26, %v360_v27  ;;  %v2237_v37 = vld [vmem:[%s2139_s21 + $0x20] sm:$0xff]  ;;  %v2240_v38 = vld [vmem:[%s2139_s21 + $0x28] sm:$0xff]  ;;  %v378_v39 = vpack.c.bf16 %v2234_v36, %v2231_v35  ;;  %v2249_v41 = vld [vmem:[%s2139_s21 + $0x30] sm:$0xff] }
  0x38   : > { %1747 = vmatpush3.msra.mxu1 %v372_v2  ;;  %v422_v32 = vsel %vm393_vm0, %v386_v31, 0  ;;  %v379_v40 = vpack.c.bf16 %v2240_v38, %v2237_v37  ;;  %3193 = vst [vmem:[#allocation7_spill] sm:$0xff] %v2249_v41  ;;  %v2252_v42 = vld [vmem:[%s2139_s21 + $0x38] sm:$0xff]  ;;  %v2255_v43 = vld [vmem:[%s2139_s21 + $0x40] sm:$0xff]  ;;  %v2258_v44 = vld [vmem:[%s2139_s21 + $0x48] sm:$0xff] }
  0x39   : > { %1748 = vmatprep.subr.mxu1 %v371_v10  ;;  %v419_v34 = vsel %vm393_vm0, %v385_v33, 0  ;;  %3194 = vst [vmem:[#allocation8_spill] sm:$0xff] %v2252_v42  ;;  %3195 = vst [vmem:[#allocation9_spill] sm:$0xff] %v2255_v43  ;;  %v380_v45 = vpack.c.bf16 %v2252_v42, %v2249_v41  ;;  %v381_v46 = vpack.c.bf16 %v2258_v44, %v2255_v43  ;;  %v2267_v47 = vld [vmem:[%s2139_s21 + $0x50] sm:$0xff]  ;;  %v2270_v48 = vld [vmem:[%s2139_s21 + $0x58] sm:$0xff]  ;;  %v2603_v43 = vadd.s32 4294967216, %v2301_v0 }
  0x3a   : > { %1749 = vmatpush3.msra.mxu1 %v371_v10  ;;  %3196 = vst [vmem:[#allocation10_spill] sm:$0xff] %v2258_v44  ;;  %3197 = vst [vmem:[#allocation11_spill] sm:$0xff] %v2267_v47  ;;  %v2273_v49 = vld [vmem:[%s2139_s21 + $0x60] sm:$0xff]  ;;  %v2276_v50 = vld [vmem:[%s2139_s21 + $0x68] sm:$0xff]  ;;  %v382_v51 = vpack.c.bf16 %v2270_v48, %v2267_v47 }
  0x3b   : > { %1750 = vmatprep.subr.mxu1 %v370_v9  ;;  %3198 = vst [vmem:[#allocation12_spill] sm:$0xff] %v2270_v48  ;;  %3199 = vst [vmem:[#allocation13_spill] sm:$0xff] %v2273_v49  ;;  %v383_v52 = vpack.c.bf16 %v2276_v50, %v2273_v49  ;;  %v2285_v53 = vld [vmem:[%s2139_s21 + $0x70] sm:$0xff]  ;;  %v2288_v54 = vld [vmem:[%s2139_s21 + $0x78] sm:$0xff]  ;;  %v3157_v49 = vmov 0.0   ;;  %s1572_s21 = sshll.u32 %s2000_s25, 1 }
  0x3c   : > { %1711 = vmatpush3.bf16.xpose.msra.mxu0 %v437_v12  ;;  %1751 = vmatpush3.msra.mxu1 %v370_v9  ;;  %3200 = vst [vmem:[#allocation14_spill] sm:$0xff] %v2276_v50  ;;  %3201 = vst [vmem:[#allocation15_spill] sm:$0xff] %v2285_v53  ;;  %v384_v55 = vpack.c.bf16 %v2288_v54, %v2285_v53  ;;  %v2296_v56 = vld [vmem:[%s3145_s2] ss:$0 sm:$0xff]  ;;  %s2815_s25 = sadd.s32 %s1996_s24, %s1572_s21 }
  0x3d   : > { %1836 = vmatprep.subr.msk.bf16.mxu0 %vm393_vm0, %v390_v13  ;;  %1752 = vmatprep.subr.mxu1 %v369_v14  ;;  %3202 = vst [vmem:[#allocation16_spill] sm:$0xff] %v2288_v54  ;;  %p330_p7 = scmp.lt.s32.totalorder %s2815_s25, 3  ;;  %s1573_s9 = sshll.u32 %s2815_s25, 4 }
  0x3e   : > { %1753 = vmatpush3.msra.mxu1 %v369_v14  ;;  %p321_p10 = scmp.lt.s32.totalorder %s1573_s9, 63 }
  0x3f   : > { %1754 = vmatprep.subr.mxu1 %v368_v15  ;;  %s331_s27 = scalar_select %p330_p7, %s2815_s25, 3 }
  0x40   : > { %1755 = vmatpush3.msra.mxu1 %v368_v15  ;;  %s3260_s9 = smov (!%p321_p10, %s1573_s9), 63 }
  0x41   : > { %1756 = vmatprep.subr.mxu1 %v367_v16  ;;  %s332_s14 = scalar_lea.vmem %s3147_s4, %s331_s27  ;;  %s1574_s15 = sshll.u32 %s3260_s9, 3 }
  0x42   : > { %1757 = vmatpush3.msra.mxu1 %v367_v16  ;;  %s2909_s16 = scalar_lea.vmem %s3146_s3, %s1574_s15 }
  0x43   : > { %1758 = vmatprep.subr.mxu1 %v366_v19 }
  0x44   : > { %1713 = vmatpush3.bf16.xpose.msra.mxu0 %v434_v17  ;;  %1759 = vmatpush3.msra.mxu1 %v366_v19 }
  0x45   : > { %1837 = vmatprep.subr.msk.bf16.mxu0 %vm393_vm0, %v389_v18  ;;  %1760 = vmatprep.subr.mxu1 %v365_v20 }
  0x46   : > { %1761 = vmatpush3.msra.mxu1 %v365_v20 }
  0x47   : > { %1762 = vmatprep.subr.mxu1 %v364_v21 }
  0x48   : > { %1763 = vmatpush3.msra.mxu1 %v364_v21 }
  0x49   : > { %1764 = vmatprep.subr.mxu1 %v363_v22 }
  0x4a   : > { %1765 = vmatpush3.msra.mxu1 %v363_v22 }
  0x4b   : > { %1766 = vmatprep.subr.mxu1 %v362_v25 }
  0x4c   : > { %1715 = vmatpush3.bf16.xpose.msra.mxu0 %v431_v23  ;;  %1767 = vmatpush3.msra.mxu1 %v362_v25 }
  0x4d   : > { %1838 = vmatprep.subr.msk.bf16.mxu0 %vm393_vm0, %v388_v24  ;;  %1768 = vmatprep.subr.mxu1 %v361_v26 }
  0x4e   : > { %1769 = vmatpush3.msra.mxu1 %v361_v26 }
  0x4f   : > { %1770 = vmatprep.subr.mxu1 %v360_v27 }
  0x50   : > { %1771 = vmatpush3.msra.mxu1 %v360_v27 }
  0x54   : > { %1717 = vmatpush3.bf16.xpose.msra.mxu0 %v428_v28 }
  0x55   : > { %1839 = vmatprep.subr.msk.bf16.mxu0 %vm393_vm0, %v387_v29 }
  0x5c   : > { %1719 = vmatpush3.bf16.xpose.msra.mxu0 %v425_v30 }
  0x5d   : > { %1840 = vmatprep.subr.msk.bf16.mxu0 %vm393_vm0, %v386_v31 }
  0x64   : > { %1721 = vmatpush3.bf16.xpose.msra.mxu0 %v422_v32 }
  0x65   : > { %1841 = vmatprep.subr.msk.bf16.mxu0 %vm393_vm0, %v385_v33 }
  0x6c   : > { %1723 = vmatpush3.bf16.xpose.msra.mxu0 %v419_v34 }
  0x73   : > { %1725 = vmatmul.mubr.msk.bf16.vlgmr.msra.gmra.mxu0 %vm393_vm0, %v378_v39 }
  0x74   : > { %1728 = vmatprep.mubr.msk.bf16.mxu0 %vm393_vm0, %v379_v40 }
  0x7b   : > { %1729 = vmatmul.mubr.msk.bf16.gmra.mxu0 %vm393_vm0, %v380_v45 }
  0x7c   : > { %1732 = vmatprep.mubr.msk.bf16.mxu0 %vm393_vm0, %v381_v46 }
  0x83   : > { %1733 = vmatmul.mubr.msk.bf16.gmra.mxu0 %vm393_vm0, %v382_v51 }
  0x84   : > { %1736 = vmatprep.mubr.msk.bf16.mxu0 %vm393_vm0, %v383_v52 }
  0x8b   : > { %1737 = vmatmul.mubr.msk.bf16.gmra.mxu0 %vm393_vm0, %v384_v55 }
 0x133   : > { %v1726_v57 = vpop.f32.mrf.mxu0 }
 0x134   : > { %v547_v59 = vsub.f32 %v2296_v56, %v1726_v57 }
 0x135   : > { %v476_v60 = vpop.f32.mrf.mxu0 }
 0x136   : > { %vm579_vm1 = vcmp.lt.s32.totalorder %v547_v59, 0  ;;  %v595_v61 = vxor.u32 2147483647, %v547_v59  ;;  %v545_v62 = vsub.f32 %v2296_v56, %v476_v60 }
 0x137   : > { %v1727_v63 = vpop.f32.mrf.mxu0 }
 0x138   : > { %v611_v1 = vsel %vm579_vm1, %v595_v61, %v547_v59  ;;  %vm577_vm2 = vcmp.lt.s32.totalorder %v545_v62, 0  ;;  %v593_v2 = vxor.u32 2147483647, %v545_v62  ;;  %v548_v3 = vsub.f32 %v2296_v56, %v1727_v63 }
 0x139   : > { %v629_v4 = vand.u32 4294967168, %v611_v1  ;;  %v479_v5 = vpop.f32.mrf.mxu0 }
 0x13a   : > { %v609_v6 = vsel %vm577_vm2, %v593_v2, %v545_v62  ;;  %vm580_vm3 = vcmp.lt.s32.totalorder %v548_v3, 0  ;;  %v596_v9 = vxor.u32 2147483647, %v548_v3  ;;  %v546_v10 = vsub.f32 %v2296_v56, %v479_v5 }
 0x13b   : > { %v627_v11 = vand.u32 4294967168, %v609_v6  ;;  %v1730_v12 = vpop.f32.mrf.mxu0  ;;  %v2306_v13 = vor.u32 %v629_v4, %v2301_v0 }
 0x13c   : > { %v612_v14 = vsel %vm580_vm3, %v596_v9, %v548_v3  ;;  %vm578_vm4 = vcmp.lt.s32.totalorder %v546_v10, 0  ;;  %v594_v15 = vxor.u32 2147483647, %v546_v10  ;;  %v551_v16 = vsub.f32 %v2296_v56, %v1730_v12 }
 0x13d   : > { %3203 = vst [vmem:[#allocation17_spill] sm:$0xff] %v2306_v13  ;;  %v630_v17 = vand.u32 4294967168, %v612_v14  ;;  %v492_v18 = vpop.f32.mrf.mxu0  ;;  %v688_v19 = vshra.s32 %v2306_v13, 16  ;;  %v2311_v20 = vor.u32 %v627_v11, %v2301_v0 }
 0x13e   : > { %v610_v21 = vsel %vm578_vm4, %v594_v15, %v546_v10  ;;  %vm583_vm5 = vcmp.lt.s32.totalorder %v551_v16, 0  ;;  %v599_v22 = vxor.u32 2147483647, %v551_v16  ;;  %v549_v23 = vsub.f32 %v2296_v56, %v492_v18 }
 0x13f   : > { %3204 = vst [vmem:[#allocation18_spill] sm:$0xff] %v2311_v20  ;;  %v628_v24 = vand.u32 4294967168, %v610_v21  ;;  %v1731_v25 = vpop.f32.mrf.mxu0  ;;  %v2314_v26 = vcvt.s32.f32 %v688_v19  ;;  %v660_v27 = vshra.s32 %v2311_v20, 16  ;;  %v2318_v28 = vor.u32 %v630_v17, %v2301_v0 }
 0x140   : > { %v615_v29 = vsel %vm583_vm5, %v599_v22, %v551_v16  ;;  %vm581_vm6 = vcmp.lt.s32.totalorder %v549_v23, 0  ;;  %v597_v30 = vxor.u32 2147483647, %v549_v23  ;;  %v552_v31 = vsub.f32 %v2296_v56, %v1731_v25 }
 0x141   : > { %3205 = vst [vmem:[#allocation19_spill] sm:$0xff] %v2318_v28  ;;  %v633_v32 = vand.u32 4294967168, %v615_v29  ;;  %691 = vmin.xlane.f32.xlu1 %v2314_v26  ;;  %v495_v33 = vpop.f32.mrf.mxu0  ;;  %v2322_v34 = vcvt.s32.f32 %v660_v27  ;;  %v702_v39 = vshra.s32 %v2318_v28, 16  ;;  %v2326_v40 = vor.u32 %v628_v24, %v2301_v0 }
 0x142   : > { %v613_v45 = vsel %vm581_vm6, %v597_v30, %v549_v23  ;;  %vm584_vm7 = vcmp.lt.s32.totalorder %v552_v31, 0  ;;  %v600_v46 = vxor.u32 2147483647, %v552_v31  ;;  %v550_v51 = vsub.f32 %v2296_v56, %v495_v33 }
 0x143   : > { %3206 = vst [vmem:[#allocation20_spill] sm:$0xff] %v2326_v40  ;;  %v631_v52 = vand.u32 4294967168, %v613_v45  ;;  %663 = vmin.xlane.f32.xlu0 %v2322_v34  ;;  %v1734_v55 = vpop.f32.mrf.mxu0  ;;  %v2330_v57 = vcvt.s32.f32 %v702_v39  ;;  %v674_v59 = vshra.s32 %v2326_v40, 16  ;;  %v2334_v60 = vor.u32 %v633_v32, %v2301_v0 }
 0x144   : > { %v616_v61 = vsel %vm584_vm7, %v600_v46, %v552_v31  ;;  %vm582_vm8 = vcmp.lt.s32.totalorder %v550_v51, 0  ;;  %v598_v62 = vxor.u32 2147483647, %v550_v51  ;;  %v555_v63 = vsub.f32 %v2296_v56, %v1734_v55 }
 0x145   : > { %v634_v1 = vand.u32 4294967168, %v616_v61  ;;  %705 = vmin.xlane.f32.xlu1 %v2330_v57  ;;  %v508_v2 = vpop.f32.mrf.mxu0  ;;  %v2338_v3 = vcvt.s32.f32 %v674_v59  ;;  %v2341_v4 = vor.u32 %v631_v52, %v2301_v0  ;;  %v744_v14 = vshra.s32 %v2334_v60, 16 }
 0x146   : > { %v614_v5 = vsel %vm582_vm8, %v598_v62, %v550_v51  ;;  %vm587_vm9 = vcmp.lt.s32.totalorder %v555_v63, 0  ;;  %v603_v6 = vxor.u32 2147483647, %v555_v63  ;;  %v553_v9 = vsub.f32 %v2296_v56, %v508_v2 }
 0x147   : > { %v632_v10 = vand.u32 4294967168, %v614_v5  ;;  %677 = vmin.xlane.f32.xlu0 %v2338_v3  ;;  %v1735_v11 = vpop.f32.mrf.mxu0  ;;  %v716_v12 = vshra.s32 %v2341_v4, 16  ;;  %v2354_v23 = vor.u32 %v634_v1, %v2301_v0  ;;  %v2358_v31 = vcvt.s32.f32 %v744_v14 }
 0x148   : > { %v619_v15 = vsel %vm587_vm9, %v603_v6, %v555_v63  ;;  %vm585_vm10 = vcmp.lt.s32.totalorder %v553_v9, 0  ;;  %v601_v16 = vxor.u32 2147483647, %v553_v9  ;;  %v556_v17 = vsub.f32 %v2296_v56, %v1735_v11 }
 0x149   : > { %v637_v18 = vand.u32 4294967168, %v619_v15  ;;  %v511_v19 = vpop.f32.mrf.mxu0  ;;  %v2348_v21 = vcvt.s32.f32 %v716_v12  ;;  %v2351_v22 = vor.u32 %v632_v10, %v2301_v0  ;;  %v758_v59 = vshra.s32 %v2354_v23, 16 }
 0x14a   : > { %v617_v24 = vsel %vm585_vm10, %v601_v16, %v553_v9  ;;  %vm588_vm11 = vcmp.lt.s32.totalorder %v556_v17, 0  ;;  %v604_v25 = vxor.u32 2147483647, %v556_v17  ;;  %v554_v27 = vsub.f32 %v2296_v56, %v511_v19 }
 0x14b   : > { %v635_v29 = vand.u32 4294967168, %v617_v24  ;;  %719 = vmin.xlane.f32.xlu0 %v2348_v21  ;;  %v1738_v30 = vpop.f32.mrf.mxu0  ;;  %v730_v32 = vshra.s32 %v2351_v22, 16  ;;  %v2362_v33 = vor.u32 %v637_v18, %v2301_v0 }
 0x14c   : > { %v620_v39 = vsel %vm588_vm11, %v604_v25, %v556_v17  ;;  %vm586_vm12 = vcmp.lt.s32.totalorder %v554_v27, 0  ;;  %v602_v45 = vxor.u32 2147483647, %v554_v27  ;;  %v559_v46 = vsub.f32 %v2296_v56, %v1738_v30 }
 0x14d   : > { %v638_v51 = vand.u32 4294967168, %v620_v39  ;;  %v524_v52 = vpop.f32.mrf.mxu0  ;;  %v2365_v55 = vcvt.s32.f32 %v730_v32  ;;  %v2369_v61 = vor.u32 %v635_v29, %v2301_v0  ;;  %v800_v9 = vshra.s32 %v2362_v33, 16 }
 0x14e   : > { %v618_v62 = vsel %vm586_vm12, %v602_v45, %v554_v27  ;;  %vm591_vm13 = vcmp.lt.s32.totalorder %v559_v46, 0  ;;  %v607_v63 = vxor.u32 2147483647, %v559_v46  ;;  %v557_v1 = vsub.f32 %v2296_v56, %v524_v52 }
 0x14f   : > { %v636_v2 = vand.u32 4294967168, %v618_v62  ;;  %747 = vmin.xlane.f32.xlu0 %v2358_v31  ;;  %733 = vmin.xlane.f32.xlu1 %v2365_v55  ;;  %v1739_v5 = vpop.f32.mrf.mxu0  ;;  %v772_v6 = vshra.s32 %v2369_v61, 16  ;;  %v2377_v10 = vor.u32 %v638_v51, %v2301_v0  ;;  %v2380_v17 = vcvt.s32.f32 %v758_v59 }
 0x150   : > { %v623_v11 = vsel %vm591_vm13, %v607_v63, %v559_v46  ;;  %vm589_vm14 = vcmp.lt.s32.totalorder %v557_v1, 0  ;;  %v605_v12 = vxor.u32 2147483647, %v557_v1  ;;  %v560_v14 = vsub.f32 %v2296_v56, %v1739_v5 }
 0x151   : > { %v641_v15 = vand.u32 4294967168, %v623_v11  ;;  %v527_v16 = vpop.f32.mrf.mxu0  ;;  %v2382_v18 = vcvt.s32.f32 %v772_v6  ;;  %v2385_v19 = vor.u32 %v636_v2, %v2301_v0  ;;  %v2390_v30 = vcvt.s32.f32 %v800_v9 }
 0x152   : > { %v621_v24 = vsel %vm589_vm14, %v605_v12, %v557_v1  ;;  %vm592_vm15 = vcmp.lt.s32.totalorder %v560_v14, 0  ;;  %v608_v25 = vxor.u32 2147483647, %v560_v14  ;;  %v558_v27 = vsub.f32 %v2296_v56, %v527_v16 }
 0x153   : > { %v639_v29 = vand.u32 4294967168, %v621_v24  ;;  %761 = vmin.xlane.f32.xlu1 %v2380_v17  ;;  %775 = vmin.xlane.f32.xlu0 %v2382_v18  ;;  %v786_v32 = vshra.s32 %v2385_v19, 16  ;;  %v814_v46 = vshra.s32 %v2377_v10, 16  ;;  %v2400_v56 = vor.u32 %v641_v15, %v2301_v0 }
 0x154   : > { %v624_v39 = vsel %vm592_vm15, %v608_v25, %v560_v14  ;;  %vm590_vm1 = vcmp.lt.s32.totalorder %v558_v27, 0  ;;  %v606_v45 = vxor.u32 2147483647, %v558_v27  ;;  %v659_v25 = vand.u32 65535, %v2311_v20 }
 0x155   : > { %v642_v51 = vand.u32 4294967168, %v624_v39  ;;  %v2394_v52 = vcvt.s32.f32 %v786_v32  ;;  %v2397_v59 = vor.u32 %v639_v29, %v2301_v0  ;;  %v2405_v2 = vcvt.s32.f32 %v814_v46 }
 0x156   : > { %v622_v62 = vsel %vm590_vm1, %v606_v45, %v558_v27  ;;  %v856_v6 = vshra.s32 %v2400_v56, 16  ;;  %v661_v32 = vcvt.s32.f32 %v659_v25  ;;  %v687_v39 = vand.u32 65535, %v2306_v13 }
 0x157   : > { %v640_v63 = vand.u32 4294967168, %v622_v62  ;;  %803 = vmin.xlane.f32.xlu0 %v2390_v30  ;;  %789 = vmin.xlane.f32.xlu1 %v2394_v52  ;;  %v828_v1 = vshra.s32 %v2397_v59, 16  ;;  %v2414_v11 = vor.u32 %v642_v51, %v2301_v0  ;;  %v673_v45 = vand.u32 65535, %v2326_v40 }
 0x158   : > { %v2419_v14 = vcvt.s32.f32 %v856_v6  ;;  %v715_v6 = vand.u32 65535, %v2341_v4 }
 0x159   : > { %v2407_v5 = vcvt.s32.f32 %v828_v1  ;;  %v2411_v9 = vor.u32 %v640_v63, %v2301_v0  ;;  %v870_v16 = vshra.s32 %v2414_v11, 16  ;;  %v689_v63 = vcvt.s32.f32 %v687_v39 }
 0x15a   : > { %v675_v1 = vcvt.s32.f32 %v673_v45  ;;  %v717_v25 = vcvt.s32.f32 %v715_v6  ;;  %v743_v39 = vand.u32 65535, %v2334_v60  ;;  %v729_v45 = vand.u32 65535, %v2351_v22 }
 0x15b   : > { %817 = vmin.xlane.f32.xlu1 %v2405_v2  ;;  %831 = vmin.xlane.f32.xlu0 %v2407_v5  ;;  %v842_v12 = vshra.s32 %v2411_v9, 16  ;;  %v2426_v24 = vcvt.s32.f32 %v870_v16  ;;  %v771_v6 = vand.u32 65535, %v2369_v61 }
 0x15d   : > { %v2421_v15 = vcvt.s32.f32 %v842_v12  ;;  %v701_v12 = vand.u32 65535, %v2318_v28 }
 0x15f   : > { %859 = vmin.xlane.f32.xlu0 %v2419_v14  ;;  %845 = vmin.xlane.f32.xlu1 %v2421_v15 }
 0x163   : > { %873 = vmin.xlane.f32.xlu1 %v2426_v24 }
 0x1ca   : > { %v2430_v27 = vpop.xlane.xlu1 %691 }
 0x1cb   : > { %vm693_vm3 = vcmp.eq.f32.partialorder %v2314_v26, %v2430_v27 }
 0x1cc   : > { %v2432_v29 = vpop.xlane.xlu0 %663  ;;  %v694_v16 = vsel %vm693_vm3, %v689_v63, inf  ;;  %vm1117_vm3 = vcmask 130112  }
 0x1cd   : > { %vm665_vm2 = vcmp.eq.f32.partialorder %v2322_v34, %v2432_v29 }
 0x1ce   : > { %v666_v46 = vsel %vm665_vm2, %v661_v32, inf  ;;  %v2440_v51 = vpop.xlane.xlu1 %705  ;;  %v703_v32 = vcvt.s32.f32 %v701_v12  ;;  %v757_v12 = vand.u32 65535, %v2354_v23 }
 0x1cf   : > { %667 = vmin.xlane.f32.xlu0 %v666_v46  ;;  %vm707_vm5 = vcmp.eq.f32.partialorder %v2330_v57, %v2440_v51  ;;  %v745_v57 = vcvt.s32.f32 %v743_v39  ;;  %v773_v39 = vcvt.s32.f32 %v771_v6 }
 0x1d0   : > { %v2442_v62 = vpop.xlane.xlu0 %677 }
 0x1d1   : > { %vm679_vm4 = vcmp.eq.f32.partialorder %v2338_v3, %v2442_v62  ;;  %v708_v3 = vsel %vm707_vm5, %v703_v32, inf }
 0x1d2   : > { %v680_v34 = vsel %vm679_vm4, %v675_v1, inf  ;;  %vm1124_vm4 = vcmask 195712  }
 0x1d3   : > { %695 = vmin.xlane.f32.xlu0 %v694_v16  ;;  %681 = vmin.xlane.f32.xlu1 %v680_v34  ;;  %v731_v16 = vcvt.s32.f32 %v729_v45  ;;  %v759_v45 = vcvt.s32.f32 %v757_v12 }
 0x1d4   : > { %v2450_v26 = vpop.xlane.xlu0 %719 }
 0x1d5   : > { %vm721_vm6 = vcmp.eq.f32.partialorder %v2348_v21, %v2450_v26 }
 0x1d6   : > { %v722_v46 = vsel %vm721_vm6, %v717_v25, inf  ;;  %vm1131_vm6 = vcmask 261312  }
 0x1d7   : > { %723 = vmin.xlane.f32.xlu0 %v722_v46  ;;  %709 = vmin.xlane.f32.xlu1 %v708_v3  ;;  %v799_v46 = vand.u32 65535, %v2362_v33  ;;  %v785_v3 = vand.u32 65535, %v2385_v19 }
 0x1d8   : > { %v2456_v63 = vpop.xlane.xlu0 %747  ;;  %v2458_v1 = vpop.xlane.xlu1 %733 }
 0x1d9   : > { %vm749_vm7 = vcmp.eq.f32.partialorder %v2358_v31, %v2456_v63  ;;  %vm735_vm8 = vcmp.eq.f32.partialorder %v2365_v55, %v2458_v1  ;;  %v801_v6 = vcvt.s32.f32 %v799_v46  ;;  %v787_v12 = vcvt.s32.f32 %v785_v3 }
 0x1da   : > { %v750_v21 = vsel %vm749_vm7, %v745_v57, inf  ;;  %v736_v34 = vsel %vm735_vm8, %v731_v16, inf  ;;  %v855_v46 = vand.u32 65535, %v2400_v56  ;;  %v841_v3 = vand.u32 65535, %v2411_v9 }
 0x1db   : > { %751 = vmin.xlane.f32.xlu0 %v750_v21  ;;  %737 = vmin.xlane.f32.xlu1 %v736_v34  ;;  %v827_v21 = vand.u32 65535, %v2397_v59  ;;  %v813_v34 = vand.u32 65535, %v2377_v10  ;;  %vm1138_vm7 = vcmask 326912  }
 0x1dc   : > { %v2466_v25 = vpop.xlane.xlu1 %761  ;;  %v2468_v32 = vpop.xlane.xlu0 %775 }
 0x1dd   : > { %vm777_vm9 = vcmp.eq.f32.partialorder %v2382_v18, %v2468_v32  ;;  %vm763_vm10 = vcmp.eq.f32.partialorder %v2380_v17, %v2466_v25 }
 0x1de   : > { %v778_v31 = vsel %vm777_vm9, %v773_v39, inf  ;;  %v764_v55 = vsel %vm763_vm10, %v759_v45, inf  ;;  %vm1145_vm10 = vcmask 392512  }
 0x1df   : > { %779 = vmin.xlane.f32.xlu0 %v778_v31  ;;  %765 = vmin.xlane.f32.xlu1 %v764_v55  ;;  %v829_v31 = vcvt.s32.f32 %v827_v21  ;;  %v815_v55 = vcvt.s32.f32 %v813_v34  ;;  %v869_v21 = vand.u32 65535, %v2414_v11 }
 0x1e0   : > { %v2476_v57 = vpop.xlane.xlu0 %803  ;;  %v2478_v16 = vpop.xlane.xlu1 %789 }
 0x1e1   : > { %vm805_vm11 = vcmp.eq.f32.partialorder %v2390_v30, %v2476_v57  ;;  %vm791_vm12 = vcmp.eq.f32.partialorder %v2394_v52, %v2478_v16 }
 0x1e2   : > { %v806_v17 = vsel %vm805_vm11, %v801_v6, inf  ;;  %v792_v18 = vsel %vm791_vm12, %v787_v12, inf  ;;  %v857_v12 = vcvt.s32.f32 %v855_v46  ;;  %v726_v46 = vcvt.f32.s32 %v2450_v26 }
 0x1e3   : > { %807 = vmin.xlane.f32.xlu0 %v806_v17  ;;  %793 = vmin.xlane.f32.xlu1 %v792_v18  ;;  %v843_v17 = vcvt.s32.f32 %v841_v3  ;;  %v754_v3 = vcvt.f32.s32 %v2456_v63  ;;  %vm1152_vm11 = vcmask 458112  }
 0x1e4   : > { %v818_v39 = vpop.xlane.xlu1 %817  ;;  %v832_v45 = vpop.xlane.xlu0 %831 }
 0x1e5   : > { %vm833_vm13 = vcmp.eq.f32.partialorder %v2407_v5, %v832_v45  ;;  %vm819_vm14 = vcmp.eq.f32.partialorder %v2405_v2, %v818_v39  ;;  %v2521_v63 = vshll.u32 %v754_v3, 16 }
 0x1e6   : > { %v834_v30 = vsel %vm833_vm13, %v829_v31, inf  ;;  %v820_v58 = vsel %vm819_vm14, %v815_v55, inf  ;;  %v698_v31 = vcvt.f32.s32 %v2430_v27  ;;  %v670_v55 = vcvt.f32.s32 %v2432_v29 }
 0x1e7   : > { %835 = vmin.xlane.f32.xlu0 %v834_v30  ;;  %821 = vmin.xlane.f32.xlu1 %v820_v58  ;;  %v871_v58 = vcvt.s32.f32 %v869_v21  ;;  %v740_v30 = vcvt.f32.s32 %v2458_v1  ;;  %v2514_v27 = vadd.s32 4294967280, %v2301_v0  ;;  %v3207_v1 = vlaneseq }
 0x1e8   : > { %v2490_v52 = vpop.xlane.xlu0 %859  ;;  %v2492_v6 = vpop.xlane.xlu1 %845  ;;  %v699_v29 = vshll.u32 %v698_v31, 16  ;;  %v671_v21 = vshll.u32 %v670_v55, 16  ;;  %vm1159_vm14 = vcmask 523712  }
 0x1e9   : > { %vm861_vm15 = vcmp.eq.f32.partialorder %v2419_v14, %v2490_v52  ;;  %vm847_vm1 = vcmp.eq.f32.partialorder %v2421_v15, %v2492_v6  ;;  %v712_v14 = vcvt.f32.s32 %v2440_v51  ;;  %v684_v15 = vcvt.f32.s32 %v2442_v62 }
 0x1ea   : > { %v862_v5 = vsel %vm861_vm15, %v857_v12, inf  ;;  %v848_v2 = vsel %vm847_vm1, %v843_v17, inf  ;;  %v768_v12 = vcvt.f32.s32 %v2466_v25  ;;  %v810_v17 = vcvt.f32.s32 %v2476_v57 }
 0x1eb   : > { %863 = vmin.xlane.f32.xlu0 %v862_v5  ;;  %849 = vmin.xlane.f32.xlu1 %v848_v2  ;;  %v2516_v51 = vshll.u32 %v712_v14, 16  ;;  %v796_v62 = vcvt.f32.s32 %v2478_v16  ;;  %v685_v26 = vshll.u32 %v684_v15, 16  ;;  %v2519_v5 = vshll.u32 %v726_v46, 16 }
 0x1ec   : > { %v2499_v34 = vpop.xlane.xlu1 %873  ;;  %v2524_v25 = vshrl.u32 %v3207_v1, 7  ;;  %v824_v57 = vcvt.f32.s32 %v818_v39  ;;  %v838_v2 = vcvt.f32.s32 %v832_v45  ;;  %v2533_v55 = vshll.u32 %v810_v17, 16 }
 0x1ed   : > { %vm875_vm2 = vcmp.eq.f32.partialorder %v2426_v24, %v2499_v34  ;;  %v782_v24 = vcvt.f32.s32 %v2468_v32  ;;  %v2526_v32 = vshll.u32 %v740_v30, 16  ;;  %v2537_v14 = vshll.u32 %v796_v62, 16 }
 0x1ee   : > { %v876_v18 = vsel %vm875_vm2, %v871_v58, inf  ;;  %v1112_v58 = vadd.s32 4294967288, %v2301_v0  ;;  %v1122_v16 = vsub.s32 %v2514_v27, %v2524_v25  ;;  %v2540_v46 = vadd.s32 4294967264, %v2301_v0 }
 0x1ef   : > { %877 = vmin.xlane.f32.xlu1 %v876_v18  ;;  %v2529_v18 = vshll.u32 %v768_v12, 16  ;;  %v2531_v31 = vshll.u32 %v782_v24, 16  ;;  %v2543_v39 = vadd.s32 4294967272, %v2301_v0  ;;  %v866_v45 = vcvt.f32.s32 %v2490_v52 }
 0x1f0   : > { %v1110_v30 = vsub.s32 %v2301_v0, %v2524_v25  ;;  %v2548_v12 = vshll.u32 %v824_v57, 16  ;;  %v2550_v24 = vshll.u32 %v838_v2, 16  ;;  %v852_v17 = vcvt.f32.s32 %v2492_v6 }
 0x1f1   : > { %v1115_v27 = vsub.s32 %v1112_v58, %v2524_v25  ;;  %v2557_v1 = vadd.s32 4294967248, %v2301_v0  ;;  %v2560_v52 = vadd.s32 4294967256, %v2301_v0  ;;  %v1136_v2 = vsub.s32 %v2540_v46, %v2524_v25 }
 0x1f2   : > { %v1129_v6 = vsub.s32 %v2543_v39, %v2524_v25  ;;  %v2570_v58 = vshll.u32 %v866_v45, 16  ;;  %v2574_v50 = vshll.u32 %v852_v17, 16  ;;  %v3162_v39 = vmov 1.0  }
 0x1f3   : > { %vm1166_vm15 = vcmask 589312  }
 0x258   : > { %v668_v15 = vpop.xlane.xlu0 %667 }
 0x259   : > { %v669_v3 = vcvt.f32.s32 %v668_v15  ;;  %v880_v15 = vcvt.f32.s32 %v2499_v34 }
 0x25b   : > { %v2554_v62 = vadd.s32 %v671_v21, %v669_v3  ;;  %v2568_v21 = vadd.s32 4294967232, %v2301_v0  ;;  %v2598_v48 = vshll.u32 %v880_v15, 16 }
 0x25c   : > { %v696_v57 = vpop.xlane.xlu0 %695  ;;  %v682_v54 = vpop.xlane.xlu1 %681 }
 0x25d   : > { %3208 = vst [vmem:[#allocation21_spill] sm:$0xff] %v2554_v62  ;;  %v697_v3 = vcvt.f32.s32 %v696_v57  ;;  %v683_v53 = vcvt.f32.s32 %v682_v54  ;;  %vm3177_vm5 = vcmp.eq.s32.totalorder %v2311_v20, %v2554_v62  ;;  %v883_v34 = vand.u32 127, %v2554_v62 }
 0x25e   : > { %v2581_v46 = vsel %vm3177_vm5, 1.0, %v3157_v49  ;;  %1772 = vmatprep.mubr.msk.f32.mxu1 %vm3177_vm5, %v3162_v39  ;;  %v2588_v54 = vadd.s32 4294967240, %v2301_v0  ;;  %v1150_v57 = vsub.s32 %v2557_v1, %v2524_v25  ;;  %vm1187_vm5 = vcmask 786112  }
 0x25f   : > { %v2590_v45 = vadd.s32 %v699_v29, %v697_v3  ;;  %v2592_v17 = vadd.s32 %v685_v26, %v683_v53  ;;  %v2606_v53 = vadd.s32 4294967224, %v2301_v0  ;;  %v1111_v49 = vrot.slane %v883_v34, %v1110_v30 }
 0x260   : > { %v724_v47 = vpop.xlane.xlu0 %723  ;;  %v710_v44 = vpop.xlane.xlu1 %709 }
 0x261   : > { %3209 = vst [vmem:[#allocation22_spill] sm:$0xff] %v2590_v45  ;;  %3210 = vst [vmem:[#allocation23_spill] sm:$0xff] %v2592_v17  ;;  %v885_v29 = vand.u32 127, %v2590_v45  ;;  %v884_v26 = vand.u32 127, %v2592_v17  ;;  %v725_v1 = vcvt.f32.s32 %v724_v47  ;;  %v711_v3 = vcvt.f32.s32 %v710_v44 }
 0x262   : > { %vm3180_vm8 = vcmp.eq.s32.totalorder %v2326_v40, %v2592_v17  ;;  %vm3186_vm9 = vcmp.eq.s32.totalorder %v2306_v13, %v2590_v45  ;;  %v3212_v47 = vmov 1.0   ;;  %v3213_v44 = vmov 0.0  }
 0x263   : > { %v1123_v39 = vrot.slane %v885_v29, %v1122_v16  ;;  %v1116_v62 = vrot.slane %v884_v26, %v1115_v27  ;;  %v2617_v20 = vadd.s32 %v2519_v5, %v725_v1  ;;  %v2620_v42 = vadd.s32 %v2516_v51, %v711_v3  ;;  %1773 = vmatmul.mubr.msk.f32.vlgmr.msra.gmra.mxu1 %vm3180_vm8, %v3212_v47 }
 0x264   : > { %v2630_v30 = vsel %vm3180_vm8, 1.0, %v3213_v44  ;;  %v2636_v5 = vsel %vm3186_vm9, 1.0, %v3213_v44  ;;  %1775 = vmatprep.mubr.msk.f32.mxu1 %vm3186_vm9, %v3212_v47  ;;  %v752_v51 = vpop.xlane.xlu0 %751  ;;  %v738_v16 = vpop.xlane.xlu1 %737 }
 0x265   : > { %3211 = vst [vmem:[#allocation24_spill] sm:$0xff] %v2620_v42  ;;  %v1118_v29 = vsel %vm1117_vm3, %v1116_v62, %v1111_v49  ;;  %v887_v26 = vand.u32 127, %v2617_v20  ;;  %v886_v1 = vand.u32 127, %v2620_v42  ;;  %v753_v3 = vcvt.f32.s32 %v752_v51 }
 0x266   : > { %v1125_v15 = vsel %vm1124_vm4, %v1123_v39, %v1118_v29  ;;  %v739_v17 = vcvt.f32.s32 %v738_v16  ;;  %vm3187_vm12 = vcmp.eq.s32.totalorder %v2318_v28, %v2620_v42  ;;  %vm903_vm13 = vcmp.eq.s32.totalorder %v2341_v4, %v2617_v20 }
 0x267   : > { %v1137_v27 = vrot.slane %v887_v26, %v1136_v2  ;;  %v1130_v40 = vrot.slane %v886_v1, %v1129_v6  ;;  %v2655_v34 = vadd.s32 %v2521_v63, %v753_v3  ;;  %v2661_v49 = vsel %vm3187_vm12, 1.0, %v3213_v44  ;;  %1776 = vmatmul.mubr.msk.f32.gmra.mxu1 %vm3187_vm12, %v3212_v47 }
 0x268   : > { %v2668_v62 = vadd.s32 %v2526_v32, %v739_v17  ;;  %v2674_v63 = vsel %vm903_vm13, 1.0, %v3213_v44  ;;  %1778 = vmatprep.mubr.msk.f32.mxu1 %vm903_vm13, %v3212_v47  ;;  %v780_v2 = vpop.xlane.xlu0 %779  ;;  %v766_v6 = vpop.xlane.xlu1 %765  ;;  %v2681_v39 = vadd.s32 4294967200, %v2301_v0  ;;  %v2684_v51 = vadd.s32 4294967208, %v2301_v0 }
 0x269   : > { %v1132_v32 = vsel %vm1131_vm6, %v1130_v40, %v1125_v15  ;;  %v889_v17 = vand.u32 127, %v2655_v34  ;;  %v781_v16 = vcvt.f32.s32 %v780_v2  ;;  %v767_v29 = vcvt.f32.s32 %v766_v6 }
 0x26a   : > { %v1139_v26 = vsel %vm1138_vm7, %v1137_v27, %v1132_v32  ;;  %v888_v1 = vand.u32 127, %v2668_v62  ;;  %vm904_vm1 = vcmp.eq.s32.totalorder %v2351_v22, %v2668_v62  ;;  %vm905_vm2 = vcmp.eq.s32.totalorder %v2334_v60, %v2655_v34 }
 0x26b   : > { %v1151_v3 = vrot.slane %v889_v17, %v1150_v57  ;;  %v2695_v45 = vadd.s32 %v2531_v31, %v781_v16  ;;  %v2698_v40 = vadd.s32 %v2529_v18, %v767_v29  ;;  %v2704_v15 = vsel %vm904_vm1, 1.0, %v3213_v44  ;;  %1779 = vmatmul.mubr.msk.f32.gmra.mxu1 %vm904_vm1, %v3212_v47 }
 0x26c   : > { %vm1173_vm3 = vcmask 654912   ;;  %v3214_v57 = vsub.s32 %v2560_v52, %v2524_v25  ;;  %v2717_v18 = vsel %vm905_vm2, 1.0, %v3213_v44  ;;  %1781 = vmatprep.mubr.msk.f32.mxu1 %vm905_vm2, %v3212_v47  ;;  %v808_v27 = vpop.xlane.xlu0 %807  ;;  %v794_v2 = vpop.xlane.xlu1 %793  ;;  %v1192_v6 = vsub.s32 %v2681_v39, %v2524_v25 }
 0x26d   : > { %vm1180_vm4 = vcmask 720512   ;;  %v2726_v52 = vadd.s32 4294967184, %v2301_v0  ;;  %v891_v32 = vand.u32 127, %v2695_v45  ;;  %v890_v17 = vand.u32 127, %v2698_v40 }
 0x26e   : > { %v1144_v31 = vrot.slane %v888_v1, %v3214_v57  ;;  %v809_v16 = vcvt.f32.s32 %v808_v27  ;;  %v795_v29 = vcvt.f32.s32 %v794_v2  ;;  %vm906_vm6 = vcmp.eq.s32.totalorder %v2354_v23, %v2698_v40 }
 0x26f   : > { %vm907_vm7 = vcmp.eq.s32.totalorder %v2369_v61, %v2695_v45  ;;  %v1185_v39 = vsub.s32 %v2684_v51, %v2524_v25  ;;  %v3215_v57 = vsub.s32 %v2568_v21, %v2524_v25  ;;  %1782 = vmatmul.mubr.msk.f32.gmra.mxu1 %vm906_vm6, %v3212_v47  ;;  %v2758_v21 = vsel %vm906_vm6, 1.0, %v3213_v44 }
 0x270   : > { %v1146_v1 = vsel %vm1145_vm10, %v1144_v31, %v1139_v26  ;;  %v3216_v26 = vsub.s32 %v2588_v54, %v2524_v25  ;;  %v2745_v2 = vadd.s32 %v2533_v55, %v809_v16  ;;  %v2752_v51 = vadd.s32 %v2537_v14, %v795_v29  ;;  %1784 = vmatprep.mubr.msk.f32.mxu1 %vm907_vm7, %v3212_v47  ;;  %v836_v54 = vpop.xlane.xlu0 %835  ;;  %v822_v14 = vpop.xlane.xlu1 %821 }
 0x271   : > { %v1165_v13 = vrot.slane %v891_v32, %v3215_v57  ;;  %v1153_v27 = vsel %vm1152_vm11, %v1151_v3, %v1146_v1  ;;  %v2764_v55 = vsel %vm907_vm7, 1.0, %v3213_v44  ;;  %v1206_v3 = vsub.s32 %v2726_v52, %v2524_v25 }
 0x272   : > { %v1158_v31 = vrot.slane %v890_v17, %v3216_v26  ;;  %v893_v17 = vand.u32 127, %v2745_v2  ;;  %v837_v16 = vcvt.f32.s32 %v836_v54  ;;  %v823_v29 = vcvt.f32.s32 %v822_v14 }
 0x273   : > { %v892_v57 = vand.u32 127, %v2752_v51  ;;  %vm908_vm10 = vcmp.eq.s32.totalorder %v2385_v19, %v2752_v51  ;;  %vm909_vm11 = vcmp.eq.s32.totalorder %v2362_v33, %v2745_v2  ;;  %v3217_v52 = vsub.s32 %v2603_v43, %v2524_v25 }
 0x274   : > { %v1160_v32 = vsel %vm1159_vm14, %v1158_v31, %v1153_v27  ;;  %v2785_v26 = vadd.s32 %v2550_v24, %v837_v16  ;;  %v2788_v31 = vadd.s32 %v2548_v12, %v823_v29  ;;  %1785 = vmatmul.mubr.msk.f32.gmra.mxu1 %vm908_vm10, %v3212_v47  ;;  %v3218_v43 = vsub.s32 %v2606_v53, %v2524_v25  ;;  %v864_v24 = vpop.xlane.xlu0 %863 }
 0x275   : > { %v1167_v1 = vsel %vm1166_vm15, %v1165_v13, %v1160_v32  ;;  %v1179_v27 = vrot.slane %v893_v17, %v3217_v52  ;;  %v2794_v13 = vsel %vm908_vm10, 1.0, %v3213_v44  ;;  %v2807_v12 = vsel %vm909_vm11, 1.0, %v3213_v44  ;;  %1787 = vmatprep.mubr.msk.f32.mxu1 %vm909_vm11, %v3212_v47  ;;  %v850_v32 = vpop.xlane.xlu1 %849 }
 0x276   : > { %v1172_v54 = vrot.slane %v892_v57, %v3218_v43  ;;  %vm1194_vm14 = vcmask 851712   ;;  %v1196_v14 = vadd.s32 4294967192, %v2301_v0  ;;  %v895_v53 = vand.u32 127, %v2785_v26 }
 0x277   : > { %v894_v17 = vand.u32 127, %v2788_v31  ;;  %v865_v16 = vcvt.f32.s32 %v864_v24  ;;  %v851_v29 = vcvt.f32.s32 %v850_v32  ;;  %vm910_vm15 = vcmp.eq.s32.totalorder %v2377_v10, %v2788_v31 }
 0x278   : > { %v1174_v57 = vsel %vm1173_vm3, %v1172_v54, %v1167_v1  ;;  %vm911_vm8 = vcmp.eq.s32.totalorder %v2397_v59, %v2785_v26  ;;  %v1210_v52 = vadd.s32 4294967176, %v2301_v0  ;;  %v1193_v43 = vrot.slane %v895_v53, %v1192_v6  ;;  %1788 = vmatmul.mubr.msk.f32.gmra.mxu1 %vm910_vm15, %v3212_v47 }
 0x279   : > { %v1181_v42 = vsel %vm1180_vm4, %v1179_v27, %v1174_v57  ;;  %v1186_v28 = vrot.slane %v894_v17, %v1185_v39  ;;  %v2827_v41 = vadd.s32 %v2570_v58, %v865_v16  ;;  %v1199_v1 = vsub.s32 %v1196_v14, %v2524_v25  ;;  %1790 = vmatprep.mubr.msk.f32.mxu1 %vm911_vm8, %v3212_v47  ;;  %v878_v6 = vpop.xlane.xlu1 %877 }
 0x27a   : > { %v2836_v54 = vadd.s32 %v2574_v50, %v851_v29  ;;  %v2842_v0 = vsel %vm910_vm15, 1.0, %v3213_v44  ;;  %v2848_v58 = vsel %vm911_vm8, 1.0, %v3213_v44  ;;  %v879_v27 = vcvt.f32.s32 %v878_v6 }
 0x27b   : > { %v1188_v50 = vsel %vm1187_vm5, %v1186_v28, %v1181_v42  ;;  %v897_v39 = vand.u32 127, %v2827_v41  ;;  %vm913_vm3 = vcmp.eq.s32.totalorder %v2400_v56, %v2827_v41  ;;  %vm1201_vm5 = vcmask 917312  }
 0x27c   : > { %v1195_v24 = vsel %vm1194_vm14, %v1193_v43, %v1188_v50  ;;  %v896_v14 = vand.u32 127, %v2836_v54  ;;  %vm912_vm4 = vcmp.eq.s32.totalorder %v2411_v9, %v2836_v54  ;;  %v2866_v32 = vsel %vm913_vm3, 1.0, %v3213_v44 }
 0x27d   : > { %v1213_v42 = vsub.s32 %v1210_v52, %v2524_v25  ;;  %v2873_v28 = vadd.s32 %v2598_v48, %v879_v27  ;;  %v2879_v53 = vsel %vm912_vm4, 1.0, %v3213_v44  ;;  %1791 = vmatmul.mubr.msk.f32.gmra.mxu1 %vm912_vm4, %v3212_v47  ;;  %v1207_v17 = vrot.slane %v897_v39, %v1206_v3 }
 0x27e   : > { %v1200_v16 = vrot.slane %v896_v14, %v1199_v1  ;;  %1793 = vmatprep.mubr.msk.f32.mxu1 %vm913_vm3, %v3212_v47  ;;  %vm1208_vm14 = vcmask 982912   ;;  %vm1215_vm12 = vcmask 1048512  }
 0x27f   : > { %v898_v48 = vand.u32 127, %v2873_v28  ;;  %vm914_vm9 = vcmp.eq.s32.totalorder %v2414_v11, %v2873_v28 }
 0x280   : > { %v1202_v25 = vsel %vm1201_vm5, %v1200_v16, %v1195_v24  ;;  %v2896_v29 = vsel %vm914_vm9, 1.0, %v3213_v44 }
 0x281   : > { %v1214_v3 = vrot.slane %v898_v48, %v1213_v42  ;;  %1794 = vmatmul.mubr.msk.f32.gmra.mxu1 %vm914_vm9, %v3212_v47  ;;  %v1209_v57 = vsel %vm1208_vm14, %v1207_v17, %v1202_v25 }
 0x283   : > { %v1216_v52 = vsel %vm1215_vm12, %v1214_v3, %v1209_v57 }
 0x284   : > { %1217 = vst [vmem:[%s332_s14] sm:$0x1] %v1216_v52 }
 0x323   : > { %v1774_v47 = vpop.f32.mrf.mxu1 }
 0x324   : > { %1093 = vst.msk [vmem:[%s2909_s16 + $0x8] sm:$0xff] %vm393_vm0, %v1774_v47 }
 0x325   : > { %v1013_v44 = vpop.f32.mrf.mxu1 }
 0x326   : > { %1092 = vst.msk [vmem:[%s2909_s16] sm:$0xff] %vm393_vm0, %v1013_v44 }
 0x327   : > { %v1777_v43 = vpop.f32.mrf.mxu1 }
 0x328   : > { %1095 = vst.msk [vmem:[%s2909_s16 + $0x18] sm:$0xff] %vm393_vm0, %v1777_v43 }
 0x329   : > { %v1023_v1 = vpop.f32.mrf.mxu1 }
 0x32a   : > { %1094 = vst.msk [vmem:[%s2909_s16 + $0x10] sm:$0xff] %vm393_vm0, %v1023_v1 }
 0x32b   : > { %v1780_v6 = vpop.f32.mrf.mxu1 }
 0x32c   : > { %1097 = vst.msk [vmem:[%s2909_s16 + $0x28] sm:$0xff] %vm393_vm0, %v1780_v6 }
 0x32d   : > { %v1033_v50 = vpop.f32.mrf.mxu1 }
 0x32e   : > { %1096 = vst.msk [vmem:[%s2909_s16 + $0x20] sm:$0xff] %vm393_vm0, %v1033_v50 }
 0x32f   : > { %v1783_v39 = vpop.f32.mrf.mxu1 }
 0x330   : > { %1099 = vst.msk [vmem:[%s2909_s16 + $0x38] sm:$0xff] %vm393_vm0, %v1783_v39 }
 0x331   : > { %v1043_v27 = vpop.f32.mrf.mxu1 }
 0x332   : > { %1098 = vst.msk [vmem:[%s2909_s16 + $0x30] sm:$0xff] %vm393_vm0, %v1043_v27 }
 0x334   : > { %v1786_v24 = vpop.f32.mrf.mxu1 }
 0x335   : > { %1101 = vst.msk [vmem:[%s2909_s16 + $0x48] sm:$0xff] %vm393_vm0, %v1786_v24 }
 0x336   : > { %v1053_v14 = vpop.f32.mrf.mxu1 }
 0x337   : > { %1100 = vst.msk [vmem:[%s2909_s16 + $0x40] sm:$0xff] %vm393_vm0, %v1053_v14 }
 0x338   : > { %v1789_v42 = vpop.f32.mrf.mxu1 }
 0x339   : > { %1103 = vst.msk [vmem:[%s2909_s16 + $0x58] sm:$0xff] %vm393_vm0, %v1789_v42 }
 0x33a   : > { %v1063_v17 = vpop.f32.mrf.mxu1 }
 0x33b   : > { %1102 = vst.msk [vmem:[%s2909_s16 + $0x50] sm:$0xff] %vm393_vm0, %v1063_v17 }
 0x33d   : > { %v1792_v16 = vpop.f32.mrf.mxu1 }
 0x33e   : > { %1105 = vst.msk [vmem:[%s2909_s16 + $0x68] sm:$0xff] %vm393_vm0, %v1792_v16 }
 0x33f   : > { %v1073_v48 = vpop.f32.mrf.mxu1 }
 0x340   : > { %1104 = vst.msk [vmem:[%s2909_s16 + $0x60] sm:$0xff] %vm393_vm0, %v1073_v48  ;;  %1221 = sbr.rel (%p1619_p11) target bundleno = 841 (0x349), region = 40 }
 0x341   : > { %v1795_v25 = vpop.f32.mrf.mxu1 }
 0x342   : > { %1107 = vst.msk [vmem:[%s2909_s16 + $0x78] sm:$0xff] %vm393_vm0, %v1795_v25 }
 0x343   : > { %v1083_v3 = vpop.f32.mrf.mxu1 }
 0x344   : > { %1106 = vst.msk [vmem:[%s2909_s16 + $0x70] sm:$0xff] %vm393_vm0, %v1083_v3 }
 0x345   : > { %v2019_v57 = vmov 0.0  }
 0x346   : > { %1222 = vst [vmem:[%s2150_s8] sm:$0x1] %v2019_v57  ;;  %1223 = vst [vmem:[%s2155_s10] sm:$0xff] %v2019_v57 }
 0x347   : > { %1224 = vst [vmem:[%s2155_s10 + $0x8] sm:$0xff] %v2019_v57  ;;  %1225 = vst [vmem:[%s2155_s10 + $0x10] sm:$0xff] %v2019_v57 }
 0x348   : > { %1226 = vst [vmem:[%s2155_s10 + $0x18] sm:$0xff] %v2019_v57 }
 0x349 PF: > { %v1228_v52 = vadd.f32 %v2630_v30, %v2581_v46  ;;  %1255 = vxpose.xlu0.b32.start [1/16] (narrow) %v2173_v7, 32  ;;  %v3219_v47 = vmov 1.0   ;;  %v3220_v60 = vld [vmem:[#allocation7_spill] sm:$0xff]  ;;  %v3222_v22 = vld [vmem:[#allocation24_spill] sm:$0xff]  ;;  %v3225_v59 = vld [vmem:[#allocation17_spill] sm:$0xff] }
 0x34a   : > { %1796 = vmatprep.subr.msk.mxu1 %vm914_vm9, %v3219_v47  ;;  %v3221_v61 = vld [vmem:[#allocation19_spill] sm:$0xff]  ;;  %v3226_v20 = vld [vmem:[#allocation22_spill] sm:$0xff]  ;;  %v3229_v56 = vld [vmem:[#allocation8_spill] sm:$0xff] }
 0x34b   : > { %1797 = vmatpush3.msk.msra.mxu1 %vm914_vm9, %v3219_v47  ;;  %v1229_v44 = vadd.f32 %v2636_v5, %v1228_v52  ;;  %vm3223_vm0 = vcmp.eq.s32.totalorder %v3221_v61, %v3222_v22  ;;  %vm3227_vm9 = vcmp.eq.s32.totalorder %v3225_v59, %v3226_v20  ;;  %v3230_v9 = vld [vmem:[#allocation20_spill] sm:$0xff]  ;;  %v3231_v46 = vld [vmem:[#allocation23_spill] sm:$0xff]  ;;  %v3234_v30 = vld [vmem:[#allocation18_spill] sm:$0xff] }
 0x34c   : > { %1798 = vmatprep.subr.msk.mxu1 %vm913_vm3, %v3219_v47  ;;  %vm3228_vm12 = vmmov %vm3227_vm9  ;;  %v3235_v5 = vld [vmem:[#allocation21_spill] sm:$0xff]  ;;  %v3239_v40 = vld [vmem:[#allocation10_spill] sm:$0xff] }
 0x34d   : > { %1799 = vmatpush3.msk.msra.mxu1 %vm913_vm3, %v3219_v47  ;;  %v1230_v7 = vadd.f32 %v2661_v49, %v1229_v44  ;;  %1256 = vxpose.xlu0.b32.cont [2/16] (narrow) %v2176_v8, 32  ;;  %v3238_v49 = vld [vmem:[#allocation9_spill] sm:$0xff]  ;;  %v3240_v51 = vld [vmem:[#allocation11_spill] sm:$0xff]  ;;  %v3243_v31 = vld [vmem:[#allocation14_spill] sm:$0xff] }
 0x34e   : > { %1800 = vmatprep.subr.msk.mxu1 %vm912_vm4, %v3219_v47  ;;  %v3242_v26 = vld [vmem:[#allocation13_spill] sm:$0xff]  ;;  %v1252_v28 = vld [vmem:[%s2155_s10 + $0x8] sm:$0xff] }
 0x34f   : > { %1801 = vmatpush3.msk.msra.mxu1 %vm912_vm4, %v3219_v47  ;;  %v1231_v11 = vadd.f32 %v2674_v63, %v1230_v7  ;;  %v1254_v50 = vld [vmem:[%s2155_s10 + $0x18] sm:$0xff]  ;;  %v1253_v27 = vld [vmem:[%s2155_s10 + $0x10] sm:$0xff] }
 0x350   : > { %1802 = vmatprep.subr.msk.mxu1 %vm911_vm8, %v3219_v47 }
 0x351   : > { %1803 = vmatpush3.msk.msra.mxu1 %vm911_vm8, %v3219_v47  ;;  %v1232_v8 = vadd.f32 %v2704_v15, %v1231_v11  ;;  %1257 = vxpose.xlu0.b32.cont [3/16] (narrow) %v2231_v35, 32  ;;  %vm3224_vm8 = vmmov %vm3223_vm0 }
 0x352   : > { %1804 = vmatprep.subr.msk.mxu1 %vm910_vm15, %v3219_v47 }
 0x353   : > { %1805 = vmatpush3.msk.msra.mxu1 %vm910_vm15, %v3219_v47  ;;  %v1233_v41 = vadd.f32 %v2717_v18, %v1232_v8  ;;  %v1227_v18 = vld [vmem:[%s2150_s8] sm:$0x1] }
 0x354   : > { %1806 = vmatprep.subr.msk.mxu1 %vm909_vm11, %v3219_v47 }
 0x355   : > { %1807 = vmatpush3.msk.msra.mxu1 %vm909_vm11, %v3219_v47  ;;  %v1234_v35 = vadd.f32 %v2758_v21, %v1233_v41  ;;  %1258 = vxpose.xlu0.b32.cont [4/16] (narrow) %v2234_v36, 32 }
 0x356   : > { %1808 = vmatprep.subr.msk.mxu1 %vm908_vm10, %v3219_v47 }
 0x357   : > { %1809 = vmatpush3.msk.msra.mxu1 %vm908_vm10, %v3219_v47  ;;  %v1235_v10 = vadd.f32 %v2764_v55, %v1234_v35  ;;  %v3241_v55 = vld [vmem:[#allocation12_spill] sm:$0xff] }
 0x358   : > { %1810 = vmatprep.subr.msk.mxu1 %vm907_vm7, %v3219_v47 }
 0x359   : > { %1811 = vmatpush3.msk.msra.mxu1 %vm907_vm7, %v3219_v47  ;;  %v1236_v36 = vadd.f32 %v2794_v13, %v1235_v10  ;;  %1259 = vxpose.xlu0.b32.cont [5/16] (narrow) %v2237_v37, 32  ;;  %v3244_v13 = vld [vmem:[#allocation15_spill] sm:$0xff] }
 0x35a   : > { %1812 = vmatprep.subr.msk.mxu1 %vm906_vm6, %v3219_v47 }
 0x35b   : > { %1813 = vmatpush3.msk.msra.mxu1 %vm906_vm6, %v3219_v47  ;;  %v1237_v33 = vadd.f32 %v2807_v12, %v1236_v36  ;;  %v3245_v12 = vld [vmem:[#allocation16_spill] sm:$0xff] }
 0x35c   : > { %1814 = vmatprep.subr.msk.mxu1 %vm905_vm2, %v3219_v47 }
 0x35d   : > { %1815 = vmatpush3.msk.msra.mxu1 %vm905_vm2, %v3219_v47  ;;  %v1238_v37 = vadd.f32 %v2842_v0, %v1237_v33  ;;  %1260 = vxpose.xlu0.b32.cont [6/16] (narrow) %v2240_v38, 32  ;;  %vm3236_vm2 = vcmp.eq.s32.totalorder %v3234_v30, %v3235_v5 }
 0x35e   : > { %1816 = vmatprep.subr.msk.mxu1 %vm904_vm1, %v3219_v47  ;;  %vm3237_vm6 = vmmov %vm3236_vm2 }
 0x35f   : > { %1817 = vmatpush3.msk.msra.mxu1 %vm904_vm1, %v3219_v47  ;;  %v1239_v23 = vadd.f32 %v2848_v58, %v1238_v37 }
 0x360   : > { %1818 = vmatprep.subr.msk.mxu1 %vm903_vm13, %v3219_v47 }
 0x361   : > { %1819 = vmatpush3.msk.msra.mxu1 %vm903_vm13, %v3219_v47  ;;  %v1240_v38 = vadd.f32 %v2879_v53, %v1239_v23  ;;  %1261 = vxpose.xlu0.b32.cont [7/16] (narrow) %v3220_v60, 32  ;;  %vm3232_vm13 = vcmp.eq.s32.totalorder %v3230_v9, %v3231_v46 }
 0x362   : > { %1820 = vmatprep.subr.msk.mxu1 %vm3223_vm0, %v3219_v47  ;;  %vm3233_vm1 = vmmov %vm3232_vm13 }
 0x363   : > { %1821 = vmatpush3.msk.msra.mxu1 %vm3224_vm8, %v3219_v47  ;;  %v1241_v19 = vadd.f32 %v2866_v32, %v1240_v38 }
 0x364   : > { %1822 = vmatprep.subr.msk.mxu1 %vm3227_vm9, %v3219_v47 }
 0x365   : > { %1823 = vmatpush3.msk.msra.mxu1 %vm3228_vm12, %v3219_v47  ;;  %v1242_v4 = vadd.f32 %v2896_v29, %v1241_v19  ;;  %1262 = vxpose.xlu0.b32.cont [8/16] (narrow) %v3229_v56, 32  ;;  %v1251_v29 = vld [vmem:[%s2155_s10] sm:$0xff] }
 0x366   : > { %1824 = vmatprep.subr.msk.mxu1 %vm3232_vm13, %v3219_v47 }
 0x367   : > { %1825 = vmatpush3.msk.msra.mxu1 %vm3233_vm1, %v3219_v47  ;;  %v1243_v45 = vrot.slane %v1242_v4, 4 }
 0x368   : > { %1826 = vmatprep.subr.msk.mxu1 %vm3236_vm2, %v3219_v47 }
 0x369   : > { %1827 = vmatpush3.msk.msra.mxu1 %vm3237_vm6, %v3219_v47  ;;  %v1244_v34 = vadd.f32 %v1243_v45, %v1242_v4  ;;  %1263 = vxpose.xlu0.b32.cont [9/16] (narrow) %v3238_v49, 32 }
 0x36b   : > { %v1245_v62 = vrot.slane %v1244_v34, 2 }
 0x36d   : > { %v1246_v63 = vadd.f32 %v1245_v62, %v1244_v34  ;;  %1264 = vxpose.xlu0.b32.cont [10/16] (narrow) %v3239_v40, 32 }
 0x36f   : > { %v1247_v15 = vrot.slane %v1246_v63, 1 }
 0x371   : > { %v1248_v2 = vadd.f32 %v1247_v15, %v1246_v63  ;;  %1265 = vxpose.xlu0.b32.cont [11/16] (narrow) %v3240_v51, 32 }
 0x373   : > { %v1249_v21 = vadd.f32 %v1248_v2, %v1227_v18 }
 0x375   : > { %1250 = vst [vmem:[%s2150_s8] sm:$0x1] %v1249_v21  ;;  %1266 = vxpose.xlu0.b32.cont [12/16] (narrow) %v3241_v55, 32 }
 0x379   : > { %1267 = vxpose.xlu0.b32.cont [13/16] (narrow) %v3242_v26, 32 }
 0x37d   : > { %1268 = vxpose.xlu0.b32.cont [14/16] (narrow) %v3243_v31, 32 }
 0x381   : > { %1269 = vxpose.xlu0.b32.cont [15/16] (narrow) %v3244_v13, 32 }
 0x385   : > { %1270 = vxpose.xlu0.b32.end [16/16] (narrow) %v3245_v12, 32 }
 0x3c5   : > { %v1271_v54 = vpop.trf.xlu0 }
 0x3c6   : > { %1828 = vmatprep.mubr.f32.mxu1 %v1271_v54 }
 0x3c9   : > { %v1272_v0 = vpop.trf.xlu0 }
 0x3ca   : > { %1829 = vmatmul.mubr.f32.vlgmr.msra.gmra.mxu1 %v1272_v0 }
 0x3cd   : > { %v1273_v58 = vpop.trf.xlu0 }
 0x3ce   : > { %1831 = vmatprep.mubr.f32.mxu1 %v1273_v58 }
 0x3d1   : > { %v1274_v32 = vpop.trf.xlu0 }
 0x3d2   : > { %1832 = vmatmul.mubr.f32.gmra.mxu1 %v1274_v32 }
 0x48a   : > { %v1830_v53 = vpop.f32.mrf.mxu1 }
 0x48b   : > { %v1373_v43 = vadd.f32 %v1830_v53, %v1252_v28 }
 0x48c   : > { %v1353_v1 = vpop.f32.mrf.mxu1 }
 0x48d   : > { %1377 = vst [vmem:[%s2155_s10 + $0x8] sm:$0xff] %v1373_v43  ;;  %v1372_v6 = vadd.f32 %v1353_v1, %v1251_v29 }
 0x48f   : > { %1376 = vst [vmem:[%s2155_s10] sm:$0xff] %v1372_v6 }
 0x492   : > { %v1833_v39 = vpop.f32.mrf.mxu1 }
 0x493   : > { %v1375_v24 = vadd.f32 %v1833_v39, %v1254_v50 }
 0x494   : > { %v1363_v14 = vpop.f32.mrf.mxu1 }
 0x495   : > { %1379 = vst [vmem:[%s2155_s10 + $0x18] sm:$0xff] %v1375_v24  ;;  %v1374_v42 = vadd.f32 %v1363_v14, %v1253_v27 }
 0x497   : > { %1378 = vst [vmem:[%s2155_s10 + $0x10] sm:$0xff] %v1374_v42 }
 0x498 PF: > { %s20_s28 = sadd.s32 1, %s2012_s28   ;;  %s3246_s24 = sld [smem:[#allocation5_spill]] }
 0x499   : > { %p17_p12 = scmp.ge.s32.totalorder %s20_s28, 6   ;;  %s3247_s25 = sld [smem:[#allocation6_spill]] }
 0x49a   : > { %s3248_s21 = smov %s1988_s22  ;;  %s3249_s22 = smov %s1992_s23 }
 0x49b   : > { %s3250_s23 = smov %s2121_s19  ;;  %s3251_s26 = smov %s3254_s30 }
 0x49c   : > { %s3252_s27 = smov %s3258_s7  ;;  %19 = sbr.rel (!%p17_p12) target bundleno = 5 (0x5), region = 112 }
 0x4a1   :  { %1454 = vsyncpa [#allocation3], 1 }
 0x4a2   :  { %1456 = vsyncpa [#allocation3 + $0x1], 1 }

</bundles_post_ra>
